<compile_context>
chip_gen: v5e
topology: v5e:2x2
jax: 0.10.0
libtpu: 0.0.40
codegen_flags: <defaults>
</compile_context>

<pallas_src>
import functools

import jax
import jax.numpy as jnp
from jax import lax
from jax.experimental import pallas as pl
from jax.experimental.pallas import tpu as pltpu


def _resblock_kernel(x_ref, w1_ref, w2_ref, alpha_ref, o_ref, buf_ref, *, C, H, W):
    # x_ref   : (1, C, H*W)            compact row-major flattened image
    # w1_ref  : (9, C, C)              conv1 weight, tap-major: [kh*3+kw, co, ci]
    # w2_ref  : (9, C, C)              conv2 weight, same layout
    # alpha   : (1,) SMEM              PReLU slope (single-parameter PReLU)
    # o_ref   : (1, C, H*W)            output, compact & lane-dense
    # buf_ref : (C, H*W + 2*(W+1))     scratch: zero-halo'd image, reused by both convs
    HW = H * W
    halo = W + 1

    x0 = x_ref[0]                                     # (C, HW), reused 3x

    # Horizontal wrap masks: a dj=-1 tap is invalid at w==0, a dj=+1 tap at w==W-1.
    col = lax.broadcasted_iota(jnp.int32, (1, HW), 1)
    wcol = lax.rem(col, W)
    m_l = (wcol != 0).astype(jnp.float32)             # keep for dj = -1 taps
    m_r = (wcol != W - 1).astype(jnp.float32)         # keep for dj = +1 taps

    # Zero ONLY the halo lanes; the centre span is fully overwritten below.
    # (Done every grid step so it stays correct with "parallel" megacore split.)
    buf_ref[:, pl.ds(0, halo)] = jnp.zeros((C, halo), jnp.float32)
    buf_ref[:, pl.ds(halo + HW, halo)] = jnp.zeros((C, halo), jnp.float32)

    def conv3x3(w_ref, center):
        # 9 accumulating per-tap matmuls (no im2col concat, no big VMEM temp).
        def dj_group(dj):
            acc = None
            for di in (-1, 0, 1):
                if di == 0 and dj == 0:
                    src = center                      # aligned, reuse the value
                else:
                    src = buf_ref[:, pl.ds(halo + di * W + dj, HW)]
                tap = 3 * (di + 1) + (dj + 1)
                t = jnp.dot(w_ref[tap], src, preferred_element_type=jnp.float32)
                acc = t if acc is None else acc + t
            return acc
        return dj_group(0) + dj_group(-1) * m_l + dj_group(1) * m_r

    # ---- conv1 ----
    buf_ref[:, pl.ds(halo, HW)] = x0
    c1 = conv3x3(w1_ref, x0)

    # ---- PReLU (single shared slope, SMEM scalar) ----
    a = alpha_ref[0]
    y1 = jnp.where(c1 >= 0.0, c1, c1 * a)

    # ---- conv2 (reuse the same scratch; halos are still zero) ----
    buf_ref[:, pl.ds(halo, HW)] = y1
    c2 = conv3x3(w2_ref, y1)

    # ---- residual add with the compact input (no extra slice) ----
    o_ref[0] = (c2 + x0).astype(o_ref.dtype)


def pack_resblock_weight(w):
    """(Cout, Cin, 3, 3) PyTorch Conv2d layout -> (9, Cout, Cin) tap-major.

    Call once at init (not per forward), per the perf review.
    """
    C = w.shape[0]
    return jnp.transpose(w, (2, 3, 0, 1)).reshape(9, C, C).astype(jnp.float32)


@jax.jit
def resblock_forward(x, w1_packed, w2_packed, alpha):
    """resblock forward in NCHW.

    x                    : (B, C, H, W) float32
    w1_packed, w2_packed : (9, C, C) from pack_resblock_weight
    alpha                : scalar PReLU slope (nn.PReLU() default: one parameter)
    """
    B, C, H, W = x.shape
    HW = H * W

    x_flat = x.reshape(B, C, HW)                       # free (contiguous bitcast)
    alpha_arr = jnp.asarray(alpha, jnp.float32).reshape(1)

    kernel = functools.partial(_resblock_kernel, C=C, H=H, W=W)

    out_flat = pl.pallas_call(
        kernel,
        out_shape=jax.ShapeDtypeStruct((B, C, HW), jnp.float32),
        grid_spec=pltpu.PrefetchScalarGridSpec(
            num_scalar_prefetch=0,
            grid=(B,),
            in_specs=[
                pl.BlockSpec((1, C, HW), lambda b: (b, 0, 0)),
                pl.BlockSpec((9, C, C), lambda b: (0, 0, 0)),
                pl.BlockSpec((9, C, C), lambda b: (0, 0, 0)),
                pl.BlockSpec(memory_space=pltpu.MemorySpace.SMEM),
            ],
            out_specs=pl.BlockSpec((1, C, HW), lambda b: (b, 0, 0)),
            scratch_shapes=[pltpu.VMEM((C, HW + 2 * (W + 1)), jnp.float32)],
        ),
        compiler_params=pltpu.CompilerParams(
            dimension_semantics=("parallel",)),
    )(x_flat, w1_packed, w2_packed, alpha_arr)

    return out_flat.reshape(B, C, H, W)                # free (contiguous bitcast)


def _resblock_ref(x, w1, w2, alpha):
    """Pure-JAX/XLA reference for resblock (PyTorch weight layout)."""
    dn = ("NCHW", "OIHW", "NCHW")
    y = lax.conv_general_dilated(x, w1, (1, 1), ((1, 1), (1, 1)),
                                 dimension_numbers=dn,
                                 precision=lax.Precision.HIGHEST)
    y = jnp.where(y >= 0, y, alpha * y)                # single-parameter PReLU
    y = lax.conv_general_dilated(y, w2, (1, 1), ((1, 1), (1, 1)),
                                 dimension_numbers=dn,
                                 precision=lax.Precision.HIGHEST)
    return y + x


if __name__ == "__main__":
    B, C, H, W = 2, 32, 16, 16
    key = jax.random.PRNGKey(0)
    kx, k1, k2 = jax.random.split(key, 3)

    x = jax.random.normal(kx, (B, C, H, W), jnp.float32)
    bound = 1.0 / float(C * 9) ** 0.5
    w1 = jax.random.uniform(k1, (C, C, 3, 3), jnp.float32, -bound, bound)
    w2 = jax.random.uniform(k2, (C, C, 3, 3), jnp.float32, -bound, bound)
    alpha = jnp.float32(0.25)                          # nn.PReLU() default init

    # Pack weights once (init-time), as the perf review requires.
    w1p = pack_resblock_weight(w1)
    w2p = pack_resblock_weight(w2)

    out = resblock_forward(x, w1p, w2p, alpha)
    out = jax.block_until_ready(out)

    ref = _resblock_ref(x, w1, w2, alpha)
    assert out.shape == ref.shape, (out.shape, ref.shape)
    assert jnp.allclose(out, ref, atol=2e-3, rtol=2e-3), \
        float(jnp.max(jnp.abs(out - ref)))

    print("KERNEL_OK")
</pallas_src>

<mosaic_0001>
module attributes {stable_mosaic.version = 11 : i64} {
  func.func @_resblock_kernel(%arg0: i32, %arg1: memref<1x32x256xf32, #tpu.memory_space<vmem>>, %arg2: memref<9x32x32xf32, #tpu.memory_space<vmem>>, %arg3: memref<9x32x32xf32, #tpu.memory_space<vmem>>, %arg4: memref<1xf32, #tpu.memory_space<smem>>, %arg5: memref<1x32x256xf32, #tpu.memory_space<vmem>>, %arg6: memref<32x290xf32, #tpu.memory_space<vmem>>) attributes {dimension_semantics = [#tpu.dimension_semantics<parallel>], iteration_bounds = array<i64: 2>, scalar_prefetch = 0 : i64, scratch_operands = 1 : i64, tpu.core_type = #tpu.core_type<tc>, window_params = [{transform_indices = @transform_0, window_bounds = array<i64: 1, 32, 256>}, {pipeline_mode = #tpu.pipeline_mode<synchronous>, transform_indices = @transform_1, window_bounds = array<i64: 9, 32, 32>}, {pipeline_mode = #tpu.pipeline_mode<synchronous>, transform_indices = @transform_2, window_bounds = array<i64: 9, 32, 32>}, {transform_indices = @transform_3, window_bounds = array<i64: 1>}, {transform_indices = @transform_4, window_bounds = array<i64: 1, 32, 256>}]} {
    %c0 = arith.constant 0 : index
    %c0_0 = arith.constant 0 : index
    %c0_1 = arith.constant 0 : index
    %0 = vector.load %arg1[%c0, %c0_0, %c0_1] : memref<1x32x256xf32, #tpu.memory_space<vmem>>, vector<1x32x256xf32>
    %1 = vector.shape_cast %0 : vector<1x32x256xf32> to vector<32x256xf32>
    %2 = tpu.iota {dimensions = array<i32: 1>} : vector<1x256xi32>
    %c16_i32 = arith.constant 16 : i32
    %3 = vector.broadcast %c16_i32 : i32 to vector<1x256xi32>
    %4 = arith.remsi %2, %3 : vector<1x256xi32>
    %c0_i32 = arith.constant 0 : i32
    %5 = vector.broadcast %c0_i32 : i32 to vector<1x256xi32>
    %6 = arith.cmpi ne, %4, %5 : vector<1x256xi32>
    %7 = arith.extui %6 : vector<1x256xi1> to vector<1x256xi32>
    %8 = arith.sitofp %7 : vector<1x256xi32> to vector<1x256xf32>
    %c15_i32 = arith.constant 15 : i32
    %9 = vector.broadcast %c15_i32 : i32 to vector<1x256xi32>
    %10 = arith.cmpi ne, %4, %9 : vector<1x256xi32>
    %11 = arith.extui %10 : vector<1x256xi1> to vector<1x256xi32>
    %12 = arith.sitofp %11 : vector<1x256xi32> to vector<1x256xf32>
    %cst = arith.constant 0.000000e+00 : f32
    %13 = vector.broadcast %cst : f32 to vector<32x17xf32>
    %c0_2 = arith.constant 0 : index
    %c0_3 = arith.constant 0 : index
    %14 = vector.load %arg6[%c0_2, %c0_3] : memref<32x290xf32, #tpu.memory_space<vmem>>, vector<32x17xf32>
    tpu.vector_store %arg6[%c0_2, %c0_3], %13 {strides = array<i32>} : memref<32x290xf32, #tpu.memory_space<vmem>>, vector<32x17xf32>,
    %cst_4 = arith.constant 0.000000e+00 : f32
    %15 = vector.broadcast %cst_4 : f32 to vector<32x17xf32>
    %c0_5 = arith.constant 0 : index
    %c273 = arith.constant 273 : index
    %16 = vector.load %arg6[%c0_5, %c273] : memref<32x290xf32, #tpu.memory_space<vmem>>, vector<32x17xf32>
    tpu.vector_store %arg6[%c0_5, %c273], %15 {strides = array<i32>} : memref<32x290xf32, #tpu.memory_space<vmem>>, vector<32x17xf32>,
    %c0_6 = arith.constant 0 : index
    %c17 = arith.constant 17 : index
    %17 = vector.load %arg6[%c0_6, %c17] : memref<32x290xf32, #tpu.memory_space<vmem>>, vector<32x256xf32>
    tpu.vector_store %arg6[%c0_6, %c17], %1 {strides = array<i32>} : memref<32x290xf32, #tpu.memory_space<vmem>>, vector<32x256xf32>,
    %c0_7 = arith.constant 0 : index
    %c1 = arith.constant 1 : index
    %18 = vector.load %arg6[%c0_7, %c1] : memref<32x290xf32, #tpu.memory_space<vmem>>, vector<32x256xf32>
    %c1_8 = arith.constant 1 : index
    %c0_9 = arith.constant 0 : index
    %c0_10 = arith.constant 0 : index
    %19 = vector.load %arg2[%c1_8, %c0_9, %c0_10] : memref<9x32x32xf32, #tpu.memory_space<vmem>>, vector<1x32x32xf32>
    %20 = vector.shape_cast %19 : vector<1x32x32xf32> to vector<32x32xf32>
    %cst_11 = arith.constant dense<0.000000e+00> : vector<32x256xf32>
    %21 = tpu.matmul %20, %18, %cst_11 {dimension_numbers = #tpu.dot_dimension_numbers<[1], [0], [0], [1], [0, 0, 1, 1], [], []>} : vector<32x32xf32>, vector<32x256xf32>, vector<32x256xf32> -> vector<32x256xf32>
    %c4 = arith.constant 4 : index
    %c0_12 = arith.constant 0 : index
    %c0_13 = arith.constant 0 : index
    %22 = vector.load %arg2[%c4, %c0_12, %c0_13] : memref<9x32x32xf32, #tpu.memory_space<vmem>>, vector<1x32x32xf32>
    %23 = vector.shape_cast %22 : vector<1x32x32xf32> to vector<32x32xf32>
    %cst_14 = arith.constant dense<0.000000e+00> : vector<32x256xf32>
    %24 = tpu.matmul %23, %1, %cst_14 {dimension_numbers = #tpu.dot_dimension_numbers<[1], [0], [0], [1], [0, 0, 1, 1], [], []>} : vector<32x32xf32>, vector<32x256xf32>, vector<32x256xf32> -> vector<32x256xf32>
    %25 = arith.addf %21, %24 : vector<32x256xf32>
    %c0_15 = arith.constant 0 : index
    %c33 = arith.constant 33 : index
    %26 = vector.load %arg6[%c0_15, %c33] : memref<32x290xf32, #tpu.memory_space<vmem>>, vector<32x256xf32>
    %c7 = arith.constant 7 : index
    %c0_16 = arith.constant 0 : index
    %c0_17 = arith.constant 0 : index
    %27 = vector.load %arg2[%c7, %c0_16, %c0_17] : memref<9x32x32xf32, #tpu.memory_space<vmem>>, vector<1x32x32xf32>
    %28 = vector.shape_cast %27 : vector<1x32x32xf32> to vector<32x32xf32>
    %cst_18 = arith.constant dense<0.000000e+00> : vector<32x256xf32>
    %29 = tpu.matmul %28, %26, %cst_18 {dimension_numbers = #tpu.dot_dimension_numbers<[1], [0], [0], [1], [0, 0, 1, 1], [], []>} : vector<32x32xf32>, vector<32x256xf32>, vector<32x256xf32> -> vector<32x256xf32>
    %30 = arith.addf %25, %29 : vector<32x256xf32>
    %c0_19 = arith.constant 0 : index
    %c0_20 = arith.constant 0 : index
    %31 = vector.load %arg6[%c0_19, %c0_20] : memref<32x290xf32, #tpu.memory_space<vmem>>, vector<32x256xf32>
    %c0_21 = arith.constant 0 : index
    %c0_22 = arith.constant 0 : index
    %c0_23 = arith.constant 0 : index
    %32 = vector.load %arg2[%c0_21, %c0_22, %c0_23] : memref<9x32x32xf32, #tpu.memory_space<vmem>>, vector<1x32x32xf32>
    %33 = vector.shape_cast %32 : vector<1x32x32xf32> to vector<32x32xf32>
    %cst_24 = arith.constant dense<0.000000e+00> : vector<32x256xf32>
    %34 = tpu.matmul %33, %31, %cst_24 {dimension_numbers = #tpu.dot_dimension_numbers<[1], [0], [0], [1], [0, 0, 1, 1], [], []>} : vector<32x32xf32>, vector<32x256xf32>, vector<32x256xf32> -> vector<32x256xf32>
    %c0_25 = arith.constant 0 : index
    %c16 = arith.constant 16 : index
    %35 = vector.load %arg6[%c0_25, %c16] : memref<32x290xf32, #tpu.memory_space<vmem>>, vector<32x256xf32>
    %c3 = arith.constant 3 : index
    %c0_26 = arith.constant 0 : index
    %c0_27 = arith.constant 0 : index
    %36 = vector.load %arg2[%c3, %c0_26, %c0_27] : memref<9x32x32xf32, #tpu.memory_space<vmem>>, vector<1x32x32xf32>
    %37 = vector.shape_cast %36 : vector<1x32x32xf32> to vector<32x32xf32>
    %cst_28 = arith.constant dense<0.000000e+00> : vector<32x256xf32>
    %38 = tpu.matmul %37, %35, %cst_28 {dimension_numbers = #tpu.dot_dimension_numbers<[1], [0], [0], [1], [0, 0, 1, 1], [], []>} : vector<32x32xf32>, vector<32x256xf32>, vector<32x256xf32> -> vector<32x256xf32>
    %39 = arith.addf %34, %38 : vector<32x256xf32>
    %c0_29 = arith.constant 0 : index
    %c32 = arith.constant 32 : index
    %40 = vector.load %arg6[%c0_29, %c32] : memref<32x290xf32, #tpu.memory_space<vmem>>, vector<32x256xf32>
    %c6 = arith.constant 6 : index
    %c0_30 = arith.constant 0 : index
    %c0_31 = arith.constant 0 : index
    %41 = vector.load %arg2[%c6, %c0_30, %c0_31] : memref<9x32x32xf32, #tpu.memory_space<vmem>>, vector<1x32x32xf32>
    %42 = vector.shape_cast %41 : vector<1x32x32xf32> to vector<32x32xf32>
    %cst_32 = arith.constant dense<0.000000e+00> : vector<32x256xf32>
    %43 = tpu.matmul %42, %40, %cst_32 {dimension_numbers = #tpu.dot_dimension_numbers<[1], [0], [0], [1], [0, 0, 1, 1], [], []>} : vector<32x32xf32>, vector<32x256xf32>, vector<32x256xf32> -> vector<32x256xf32>
    %44 = arith.addf %39, %43 : vector<32x256xf32>
    %45 = vector.broadcast %8 : vector<1x256xf32> to vector<32x256xf32>
    %46 = arith.mulf %44, %45 : vector<32x256xf32>
    %47 = arith.addf %30, %46 : vector<32x256xf32>
    %c0_33 = arith.constant 0 : index
    %c2 = arith.constant 2 : index
    %48 = vector.load %arg6[%c0_33, %c2] : memref<32x290xf32, #tpu.memory_space<vmem>>, vector<32x256xf32>
    %c2_34 = arith.constant 2 : index
    %c0_35 = arith.constant 0 : index
    %c0_36 = arith.constant 0 : index
    %49 = vector.load %arg2[%c2_34, %c0_35, %c0_36] : memref<9x32x32xf32, #tpu.memory_space<vmem>>, vector<1x32x32xf32>
    %50 = vector.shape_cast %49 : vector<1x32x32xf32> to vector<32x32xf32>
    %cst_37 = arith.constant dense<0.000000e+00> : vector<32x256xf32>
    %51 = tpu.matmul %50, %48, %cst_37 {dimension_numbers = #tpu.dot_dimension_numbers<[1], [0], [0], [1], [0, 0, 1, 1], [], []>} : vector<32x32xf32>, vector<32x256xf32>, vector<32x256xf32> -> vector<32x256xf32>
    %c0_38 = arith.constant 0 : index
    %c18 = arith.constant 18 : index
    %52 = vector.load %arg6[%c0_38, %c18] : memref<32x290xf32, #tpu.memory_space<vmem>>, vector<32x256xf32>
    %c5 = arith.constant 5 : index
    %c0_39 = arith.constant 0 : index
    %c0_40 = arith.constant 0 : index
    %53 = vector.load %arg2[%c5, %c0_39, %c0_40] : memref<9x32x32xf32, #tpu.memory_space<vmem>>, vector<1x32x32xf32>
    %54 = vector.shape_cast %53 : vector<1x32x32xf32> to vector<32x32xf32>
    %cst_41 = arith.constant dense<0.000000e+00> : vector<32x256xf32>
    %55 = tpu.matmul %54, %52, %cst_41 {dimension_numbers = #tpu.dot_dimension_numbers<[1], [0], [0], [1], [0, 0, 1, 1], [], []>} : vector<32x32xf32>, vector<32x256xf32>, vector<32x256xf32> -> vector<32x256xf32>
    %56 = arith.addf %51, %55 : vector<32x256xf32>
    %c0_42 = arith.constant 0 : index
    %c34 = arith.constant 34 : index
    %57 = vector.load %arg6[%c0_42, %c34] : memref<32x290xf32, #tpu.memory_space<vmem>>, vector<32x256xf32>
    %c8 = arith.constant 8 : index
    %c0_43 = arith.constant 0 : index
    %c0_44 = arith.constant 0 : index
    %58 = vector.load %arg2[%c8, %c0_43, %c0_44] : memref<9x32x32xf32, #tpu.memory_space<vmem>>, vector<1x32x32xf32>
    %59 = vector.shape_cast %58 : vector<1x32x32xf32> to vector<32x32xf32>
    %cst_45 = arith.constant dense<0.000000e+00> : vector<32x256xf32>
    %60 = tpu.matmul %59, %57, %cst_45 {dimension_numbers = #tpu.dot_dimension_numbers<[1], [0], [0], [1], [0, 0, 1, 1], [], []>} : vector<32x32xf32>, vector<32x256xf32>, vector<32x256xf32> -> vector<32x256xf32>
    %61 = arith.addf %56, %60 : vector<32x256xf32>
    %62 = vector.broadcast %12 : vector<1x256xf32> to vector<32x256xf32>
    %63 = arith.mulf %61, %62 : vector<32x256xf32>
    %64 = arith.addf %47, %63 : vector<32x256xf32>
    %c0_46 = arith.constant 0 : index
    %65 = memref.load %arg4[%c0_46] : memref<1xf32, #tpu.memory_space<smem>>
    %cst_47 = arith.constant 0.000000e+00 : f32
    %66 = vector.broadcast %cst_47 : f32 to vector<32x256xf32>
    %67 = arith.cmpf oge, %64, %66 : vector<32x256xf32>
    %68 = vector.broadcast %65 : f32 to vector<32x256xf32>
    %69 = arith.mulf %64, %68 : vector<32x256xf32>
    %70 = arith.select %67, %64, %69 : vector<32x256xi1>, vector<32x256xf32>
    %c0_48 = arith.constant 0 : index
    %c17_49 = arith.constant 17 : index
    %71 = vector.load %arg6[%c0_48, %c17_49] : memref<32x290xf32, #tpu.memory_space<vmem>>, vector<32x256xf32>
    tpu.vector_store %arg6[%c0_48, %c17_49], %70 {strides = array<i32>} : memref<32x290xf32, #tpu.memory_space<vmem>>, vector<32x256xf32>,
    %c0_50 = arith.constant 0 : index
    %c1_51 = arith.constant 1 : index
    %72 = vector.load %arg6[%c0_50, %c1_51] : memref<32x290xf32, #tpu.memory_space<vmem>>, vector<32x256xf32>
    %c1_52 = arith.constant 1 : index
    %c0_53 = arith.constant 0 : index
    %c0_54 = arith.constant 0 : index
    %73 = vector.load %arg3[%c1_52, %c0_53, %c0_54] : memref<9x32x32xf32, #tpu.memory_space<vmem>>, vector<1x32x32xf32>
    %74 = vector.shape_cast %73 : vector<1x32x32xf32> to vector<32x32xf32>
    %cst_55 = arith.constant dense<0.000000e+00> : vector<32x256xf32>
    %75 = tpu.matmul %74, %72, %cst_55 {dimension_numbers = #tpu.dot_dimension_numbers<[1], [0], [0], [1], [0, 0, 1, 1], [], []>} : vector<32x32xf32>, vector<32x256xf32>, vector<32x256xf32> -> vector<32x256xf32>
    %c4_56 = arith.constant 4 : index
    %c0_57 = arith.constant 0 : index
    %c0_58 = arith.constant 0 : index
    %76 = vector.load %arg3[%c4_56, %c0_57, %c0_58] : memref<9x32x32xf32, #tpu.memory_space<vmem>>, vector<1x32x32xf32>
    %77 = vector.shape_cast %76 : vector<1x32x32xf32> to vector<32x32xf32>
    %cst_59 = arith.constant dense<0.000000e+00> : vector<32x256xf32>
    %78 = tpu.matmul %77, %70, %cst_59 {dimension_numbers = #tpu.dot_dimension_numbers<[1], [0], [0], [1], [0, 0, 1, 1], [], []>} : vector<32x32xf32>, vector<32x256xf32>, vector<32x256xf32> -> vector<32x256xf32>
    %79 = arith.addf %75, %78 : vector<32x256xf32>
    %c0_60 = arith.constant 0 : index
    %c33_61 = arith.constant 33 : index
    %80 = vector.load %arg6[%c0_60, %c33_61] : memref<32x290xf32, #tpu.memory_space<vmem>>, vector<32x256xf32>
    %c7_62 = arith.constant 7 : index
    %c0_63 = arith.constant 0 : index
    %c0_64 = arith.constant 0 : index
    %81 = vector.load %arg3[%c7_62, %c0_63, %c0_64] : memref<9x32x32xf32, #tpu.memory_space<vmem>>, vector<1x32x32xf32>
    %82 = vector.shape_cast %81 : vector<1x32x32xf32> to vector<32x32xf32>
    %cst_65 = arith.constant dense<0.000000e+00> : vector<32x256xf32>
    %83 = tpu.matmul %82, %80, %cst_65 {dimension_numbers = #tpu.dot_dimension_numbers<[1], [0], [0], [1], [0, 0, 1, 1], [], []>} : vector<32x32xf32>, vector<32x256xf32>, vector<32x256xf32> -> vector<32x256xf32>
    %84 = arith.addf %79, %83 : vector<32x256xf32>
    %c0_66 = arith.constant 0 : index
    %c0_67 = arith.constant 0 : index
    %85 = vector.load %arg6[%c0_66, %c0_67] : memref<32x290xf32, #tpu.memory_space<vmem>>, vector<32x256xf32>
    %c0_68 = arith.constant 0 : index
    %c0_69 = arith.constant 0 : index
    %c0_70 = arith.constant 0 : index
    %86 = vector.load %arg3[%c0_68, %c0_69, %c0_70] : memref<9x32x32xf32, #tpu.memory_space<vmem>>, vector<1x32x32xf32>
    %87 = vector.shape_cast %86 : vector<1x32x32xf32> to vector<32x32xf32>
    %cst_71 = arith.constant dense<0.000000e+00> : vector<32x256xf32>
    %88 = tpu.matmul %87, %85, %cst_71 {dimension_numbers = #tpu.dot_dimension_numbers<[1], [0], [0], [1], [0, 0, 1, 1], [], []>} : vector<32x32xf32>, vector<32x256xf32>, vector<32x256xf32> -> vector<32x256xf32>
    %c0_72 = arith.constant 0 : index
    %c16_73 = arith.constant 16 : index
    %89 = vector.load %arg6[%c0_72, %c16_73] : memref<32x290xf32, #tpu.memory_space<vmem>>, vector<32x256xf32>
    %c3_74 = arith.constant 3 : index
    %c0_75 = arith.constant 0 : index
    %c0_76 = arith.constant 0 : index
    %90 = vector.load %arg3[%c3_74, %c0_75, %c0_76] : memref<9x32x32xf32, #tpu.memory_space<vmem>>, vector<1x32x32xf32>
    %91 = vector.shape_cast %90 : vector<1x32x32xf32> to vector<32x32xf32>
    %cst_77 = arith.constant dense<0.000000e+00> : vector<32x256xf32>
    %92 = tpu.matmul %91, %89, %cst_77 {dimension_numbers = #tpu.dot_dimension_numbers<[1], [0], [0], [1], [0, 0, 1, 1], [], []>} : vector<32x32xf32>, vector<32x256xf32>, vector<32x256xf32> -> vector<32x256xf32>
    %93 = arith.addf %88, %92 : vector<32x256xf32>
    %c0_78 = arith.constant 0 : index
    %c32_79 = arith.constant 32 : index
    %94 = vector.load %arg6[%c0_78, %c32_79] : memref<32x290xf32, #tpu.memory_space<vmem>>, vector<32x256xf32>
    %c6_80 = arith.constant 6 : index
    %c0_81 = arith.constant 0 : index
    %c0_82 = arith.constant 0 : index
    %95 = vector.load %arg3[%c6_80, %c0_81, %c0_82] : memref<9x32x32xf32, #tpu.memory_space<vmem>>, vector<1x32x32xf32>
    %96 = vector.shape_cast %95 : vector<1x32x32xf32> to vector<32x32xf32>
    %cst_83 = arith.constant dense<0.000000e+00> : vector<32x256xf32>
    %97 = tpu.matmul %96, %94, %cst_83 {dimension_numbers = #tpu.dot_dimension_numbers<[1], [0], [0], [1], [0, 0, 1, 1], [], []>} : vector<32x32xf32>, vector<32x256xf32>, vector<32x256xf32> -> vector<32x256xf32>
    %98 = arith.addf %93, %97 : vector<32x256xf32>
    %99 = vector.broadcast %8 : vector<1x256xf32> to vector<32x256xf32>
    %100 = arith.mulf %98, %99 : vector<32x256xf32>
    %101 = arith.addf %84, %100 : vector<32x256xf32>
    %c0_84 = arith.constant 0 : index
    %c2_85 = arith.constant 2 : index
    %102 = vector.load %arg6[%c0_84, %c2_85] : memref<32x290xf32, #tpu.memory_space<vmem>>, vector<32x256xf32>
    %c2_86 = arith.constant 2 : index
    %c0_87 = arith.constant 0 : index
    %c0_88 = arith.constant 0 : index
    %103 = vector.load %arg3[%c2_86, %c0_87, %c0_88] : memref<9x32x32xf32, #tpu.memory_space<vmem>>, vector<1x32x32xf32>
    %104 = vector.shape_cast %103 : vector<1x32x32xf32> to vector<32x32xf32>
    %cst_89 = arith.constant dense<0.000000e+00> : vector<32x256xf32>
    %105 = tpu.matmul %104, %102, %cst_89 {dimension_numbers = #tpu.dot_dimension_numbers<[1], [0], [0], [1], [0, 0, 1, 1], [], []>} : vector<32x32xf32>, vector<32x256xf32>, vector<32x256xf32> -> vector<32x256xf32>
    %c0_90 = arith.constant 0 : index
    %c18_91 = arith.constant 18 : index
    %106 = vector.load %arg6[%c0_90, %c18_91] : memref<32x290xf32, #tpu.memory_space<vmem>>, vector<32x256xf32>
    %c5_92 = arith.constant 5 : index
    %c0_93 = arith.constant 0 : index
    %c0_94 = arith.constant 0 : index
    %107 = vector.load %arg3[%c5_92, %c0_93, %c0_94] : memref<9x32x32xf32, #tpu.memory_space<vmem>>, vector<1x32x32xf32>
    %108 = vector.shape_cast %107 : vector<1x32x32xf32> to vector<32x32xf32>
    %cst_95 = arith.constant dense<0.000000e+00> : vector<32x256xf32>
    %109 = tpu.matmul %108, %106, %cst_95 {dimension_numbers = #tpu.dot_dimension_numbers<[1], [0], [0], [1], [0, 0, 1, 1], [], []>} : vector<32x32xf32>, vector<32x256xf32>, vector<32x256xf32> -> vector<32x256xf32>
    %110 = arith.addf %105, %109 : vector<32x256xf32>
    %c0_96 = arith.constant 0 : index
    %c34_97 = arith.constant 34 : index
    %111 = vector.load %arg6[%c0_96, %c34_97] : memref<32x290xf32, #tpu.memory_space<vmem>>, vector<32x256xf32>
    %c8_98 = arith.constant 8 : index
    %c0_99 = arith.constant 0 : index
    %c0_100 = arith.constant 0 : index
    %112 = vector.load %arg3[%c8_98, %c0_99, %c0_100] : memref<9x32x32xf32, #tpu.memory_space<vmem>>, vector<1x32x32xf32>
    %113 = vector.shape_cast %112 : vector<1x32x32xf32> to vector<32x32xf32>
    %cst_101 = arith.constant dense<0.000000e+00> : vector<32x256xf32>
    %114 = tpu.matmul %113, %111, %cst_101 {dimension_numbers = #tpu.dot_dimension_numbers<[1], [0], [0], [1], [0, 0, 1, 1], [], []>} : vector<32x32xf32>, vector<32x256xf32>, vector<32x256xf32> -> vector<32x256xf32>
    %115 = arith.addf %110, %114 : vector<32x256xf32>
    %116 = vector.broadcast %12 : vector<1x256xf32> to vector<32x256xf32>
    %117 = arith.mulf %115, %116 : vector<32x256xf32>
    %118 = arith.addf %101, %117 : vector<32x256xf32>
    %119 = arith.addf %118, %1 : vector<32x256xf32>
    %c0_102 = arith.constant 0 : index
    %c0_103 = arith.constant 0 : index
    %c0_104 = arith.constant 0 : index
    %120 = vector.load %arg5[%c0_102, %c0_103, %c0_104] : memref<1x32x256xf32, #tpu.memory_space<vmem>>, vector<1x32x256xf32>
    %121 = vector.shape_cast %120 : vector<1x32x256xf32> to vector<32x256xf32>
    %122 = vector.shape_cast %119 : vector<32x256xf32> to vector<1x32x256xf32>
    tpu.vector_store %arg5[%c0_102, %c0_103, %c0_104], %122 {strides = array<i32>} : memref<1x32x256xf32, #tpu.memory_space<vmem>>, vector<1x32x256xf32>,
    return
  }
  func.func @transform_0(%arg0: i32) -> (i32, i32, i32) {
    %c0_i32 = arith.constant 0 : i32
    %c0_i32_0 = arith.constant 0 : i32
    %c0_i32_1 = arith.constant 0 : i32
    return %arg0, %c0_i32, %c0_i32_0 : i32, i32, i32
  }
  func.func @transform_1(%arg0: i32) -> (i32, i32, i32) {
    %c0_i32 = arith.constant 0 : i32
    %c0_i32_0 = arith.constant 0 : i32
    %c0_i32_1 = arith.constant 0 : i32
    %c0_i32_2 = arith.constant 0 : i32
    return %c0_i32, %c0_i32_0, %c0_i32_1 : i32, i32, i32
  }
  func.func @transform_2(%arg0: i32) -> (i32, i32, i32) {
    %c0_i32 = arith.constant 0 : i32
    %c0_i32_0 = arith.constant 0 : i32
    %c0_i32_1 = arith.constant 0 : i32
    %c0_i32_2 = arith.constant 0 : i32
    return %c0_i32, %c0_i32_0, %c0_i32_1 : i32, i32, i32
  }
  func.func @transform_3(%arg0: i32) -> i32 {
    %c0_i32 = arith.constant 0 : i32
    %c0_i32_0 = arith.constant 0 : i32
    return %c0_i32 : i32
  }
  func.func @transform_4(%arg0: i32) -> (i32, i32, i32) {
    %c0_i32 = arith.constant 0 : i32
    %c0_i32_0 = arith.constant 0 : i32
    %c0_i32_1 = arith.constant 0 : i32
    return %arg0, %c0_i32, %c0_i32_0 : i32, i32, i32
  }
}

</mosaic_0001>

<bundles_post_ra>
// kernel: resblock_forward.1
= control target key start
LH: loop header
LB: loop body
LE: loop exit
PB: predicated region body
PF: predicated region fallthrough
CT: control target
= control target key end

     0   :  { %s3255_s17 = smov 0   ;;  %s4377_s0 = inlined_call_operand.vmem [shape: f32[2,32,256], index: 0, kind: input, shape index: {}]   ;;  %s4378_s1 = inlined_call_operand.vmem [shape: f32[9,32,32], index: 1, kind: input, shape index: {}]   ;;  %s4379_s2 = inlined_call_operand.vmem [shape: f32[9,32,32], index: 2, kind: input, shape index: {}]   ;;  %s4380_s3 = inlined_call_operand.<no memory space> [shape: f32[1], index: 3, kind: input, shape index: {}]   ;;  %s4381_s4 = inlined_call_operand.vmem [shape: f32[2,32,256], index: 4, kind: output, shape index: {}]  }
   0x1   :  { %9 = sst [smem:[#allocation3]] %s4380_s3 }
   0x2 LB: > { %s2540_s18 = sadd.s32 4294967295, %s3216_s17   ;;  %p2544_p0 = scmp.ge.s32.totalorder %s3216_s17, 1  ;;  %s3216_s17 = sphi %s3255_s17, %s15_s17  }
   0x3   : > { %p163_p1 = scmp.lt.s32.totalorder %s3216_s17, 3 }
   0x5   : > { %p164_p2 = pnand %p2544_p0, %p163_p1 }
   0x7   : > { %167 = sbr.rel (%p164_p2) target bundleno = 1088 (0x440), region = 36 }
   0xc   : > { %p189_p3 = scmp.lt.s32.totalorder %s2540_s18, 1  ;;  %vm236_vm0 = vcmask 138240   ;;  %v4382_v0 = vmov 0.0   ;;  %s3219_s22 = smov 17   ;;  %vm241_vm1 = vcmask 277640   ;;  %vm286_vm2 = vcmask 1047688  }
   0xd   : > { %238 = vst.msk [vmem:[#allocation2 + $0x18] sm:$0xff] %vm236_vm0, %v4382_v0  ;;  %s3220_s23 = smov 127   ;;  %s3221_s24 = smov 95   ;;  %v2557_v35 = vld [vmem:[%s4378_s1 + $0x80] sm:$0xff]  ;;  %vm321_vm3 = vcmask 261120   ;;  %vm428_vm4 = vcmask 1039360  }
   0xe   : > { %s4404_s18 = smov (!%p189_p3, %s2540_s18), 1  ;;  %237 = vst.msk [vmem:[#allocation2] sm:$0xff] %vm236_vm0, %v4382_v0  ;;  %s3222_s25 = smov 112   ;;  %v2558_v40 = vld [vmem:[%s4378_s1 + $0x88] sm:$0xff]  ;;  %v2559_v42 = vld [vmem:[%s4378_s1 + $0x90] sm:$0xff]  ;;  %vm544_vm5 = vcmask 777216  }
   0xf   : > { %239 = vst.msk [vmem:[#allocation2 + $0x30] sm:$0xff] %vm236_vm0, %v4382_v0  ;;  %s2763_s3 = sshll.u32 %s4404_s18, 6  ;;  %s3223_s26 = smov 96   ;;  %v2560_v47 = vld [vmem:[%s4378_s1 + $0x98] sm:$0xff]  ;;  %vm680_vm6 = vcmask 916480   ;;  %vm1011_vm7 = vcmask 900096  }
  0x10   : > { %240 = vst.msk [vmem:[#allocation2 + $0x48] sm:$0xff] %vm236_vm0, %v4382_v0  ;;  %s3279_s21 = scalar_lea.vmem %s4377_s0, %s2763_s3  ;;  %s3224_s27 = smov 110   ;;  %vm866_vm8 = vcmask 785408   ;;  %vm1122_vm9 = vcmask 1031168   ;;  %vm1238_vm10 = vcmask 769024  }
  0x11   : > { %v205_v1 = vld [vmem:[%s3279_s21 + $0x30] sm:$0xff]  ;;  %v203_v2 = vld [vmem:[%s3279_s21 + $0x20] sm:$0xff]  ;;  %v206_v3 = vld [vmem:[%s3279_s21 + $0x38] sm:$0xff]  ;;  %243 = vst.msk [vmem:[#allocation2 + $0x28] sm:$0xff] %vm241_vm1, %v4382_v0  ;;  %s3225_s30 = smov 126   ;;  %s3226_s7 = smov 94  }
  0x12   : > { %266 = vrot.lane.b32.xlu0 %v205_v1, %s3219_s22  ;;  %262 = vrot.lane.b32.xlu1 %v203_v2, %s3219_s22  ;;  %v201_v4 = vld [vmem:[%s3279_s21 + $0x10] sm:$0xff]  ;;  %v204_v5 = vld [vmem:[%s3279_s21 + $0x28] sm:$0xff]  ;;  %242 = vst.msk [vmem:[#allocation2 + $0x10] sm:$0xff] %vm241_vm1, %v4382_v0  ;;  %s3824_s16 = sld [smem:[#allocation3]] }
  0x13   : > { %346 = vmatpush.msra.mxu0 %v205_v1  ;;  %375 = vmatpush.msra.mxu1 %v206_v3  ;;  %v202_v6 = vld [vmem:[%s3279_s21 + $0x18] sm:$0xff]  ;;  %v200_v7 = vld [vmem:[%s3279_s21 + $0x8] sm:$0xff]  ;;  %v199_v8 = vld [vmem:[%s3279_s21] sm:$0xff]  ;;  %244 = vst.msk [vmem:[#allocation2 + $0x40] sm:$0xff] %vm241_vm1, %v4382_v0 }
  0x14   : > { %258 = vrot.lane.b32.xlu2 %v201_v4, %s3219_s22  ;;  %245 = vst.msk [vmem:[#allocation2 + $0x58] sm:$0xff] %vm241_vm1, %v4382_v0 }
  0x15   : > { %347 = vmatpush.msra.mxu0 %v203_v2  ;;  %376 = vmatpush.msra.mxu1 %v204_v5 }
  0x17   : > { %348 = vmatpush.msra.mxu0 %v201_v4  ;;  %377 = vmatpush.msra.mxu1 %v202_v6 }
  0x19   : > { %349 = vmatpush.msra.mxu0 %v199_v8  ;;  %378 = vmatpush.msra.mxu1 %v200_v7 }
  0x1a   : > { %268 = vrot.lane.b32.xlu0 %v206_v3, %s3219_s22  ;;  %264 = vrot.lane.b32.xlu1 %v204_v5, %s3219_s22 }
  0x1b   : > { %2561 = vmatmul.msk.f32.vlgmr.msra.gmra.mxu0 %vm321_vm3, %v2557_v35  ;;  %2565 = vmatmul.msk.f32.vlgmr.msra.gmra.mxu1 %vm321_vm3, %v2557_v35 }
  0x1c   : > { %260 = vrot.lane.b32.xlu2 %v202_v6, %s3219_s22 }
  0x22   : > { %256 = vrot.lane.b32.xlu1 %v200_v7, %s3219_s22  ;;  %254 = vrot.lane.b32.xlu0 %v199_v8, %s3219_s22  ;;  %v2553_v8 = vld [vmem:[%s4378_s1 + $0x20] sm:$0xff] }
  0x23   : > { %2562 = vmatmul.msk.f32.gmra.mxu0 %vm321_vm3, %v2558_v40  ;;  %2566 = vmatmul.msk.f32.gmra.mxu1 %vm321_vm3, %v2558_v40 }
  0x2b   : > { %2563 = vmatmul.msk.f32.gmra.mxu0 %vm321_vm3, %v2559_v42  ;;  %2567 = vmatmul.msk.f32.gmra.mxu1 %vm321_vm3, %v2559_v42  ;;  %v2555_v42 = vld [vmem:[%s4378_s1 + $0x30] sm:$0xff] }
  0x33   : > { %2568 = vmatmul.msk.f32.gmra.mxu1 %vm321_vm3, %v2560_v47  ;;  %2564 = vmatmul.msk.f32.gmra.mxu0 %vm321_vm3, %v2560_v47 }
  0x6e   : > { %v259_v9 = vpop.permute.xlu2 %258 }
  0x6f   : > { %290 = vst.msk [vmem:[#allocation2 + $0x18] sm:$0xff] %vm286_vm2, %v259_v9 }
  0x76   : > { %v261_v10 = vpop.permute.xlu2 %260  ;;  %v3321_v19 = vld [vmem:[#allocation2 + $0x18] sm:$0xff] }
  0x77   : > { %292 = vst.msk [vmem:[#allocation2 + $0x28] sm:$0xff] %vm236_vm0, %v261_v10  ;;  %v3319_v18 = vsel %vm236_vm0, %v259_v9, %v261_v10 }
  0x78   : > { %v3338_v28 = vpack.i.bf16 %v3319_v18, %v3321_v19 }
  0x7e   : > { %v304_v29 = vld [vmem:[#allocation2 + $0x28] sm:$0xff] }
  0x84   : > { %v267_v11 = vpop.permute.xlu0 %266  ;;  %v263_v12 = vpop.permute.xlu1 %262 }
  0x85   : > { %296 = vst.msk [vmem:[#allocation2 + $0x48] sm:$0xff] %vm286_vm2, %v267_v11 }
  0x86   : > { %293 = vst.msk [vmem:[#allocation2 + $0x30] sm:$0xff] %vm286_vm2, %v263_v12 }
  0x8c   : > { %v269_v13 = vpop.permute.xlu0 %268  ;;  %v265_v14 = vpop.permute.xlu1 %264  ;;  %v3305_v15 = vld [vmem:[#allocation2 + $0x48] sm:$0xff] }
  0x8d   : > { %v3308_v16 = vsel %vm236_vm0, %v267_v11, %v269_v13  ;;  %298 = vst.msk [vmem:[#allocation2 + $0x58] sm:$0xff] %vm236_vm0, %v269_v13  ;;  %v3323_v22 = vld [vmem:[#allocation2 + $0x30] sm:$0xff]  ;;  %v3326_v24 = vsel %vm236_vm0, %v263_v12, %v265_v14 }
  0x8e   : > { %295 = vst.msk [vmem:[#allocation2 + $0x40] sm:$0xff] %vm236_vm0, %v265_v14  ;;  %v3314_v17 = vpack.i.bf16 %v3308_v16, %v3305_v15 }
  0x90   : > { %2798 = vrot.lane.b32.xlu2 %v3314_v17, %s3220_s23 }
  0x94   : > { %v257_v20 = vpop.permute.xlu1 %256  ;;  %v255_v21 = vpop.permute.xlu0 %254  ;;  %v310_v23 = vld [vmem:[#allocation2 + $0x58] sm:$0xff] }
  0x95   : > { %289 = vst.msk [vmem:[#allocation2 + $0x10] sm:$0xff] %vm236_vm0, %v257_v20  ;;  %v3330_v25 = vpack.i.bf16 %v3323_v22, %v310_v23  ;;  %v307_v26 = vld [vmem:[#allocation2 + $0x40] sm:$0xff]  ;;  %v3347_v30 = vsel %vm236_vm0, %v255_v21, %v257_v20 }
  0x96   : > { %287 = vst.msk [vmem:[#allocation2] sm:$0xff] %vm286_vm2, %v255_v21  ;;  %v3334_v27 = vpack.i.bf16 %v307_v26, %v3326_v24 }
  0x97   : > { %2783 = vrot.lane.b32.xlu0 %v3330_v25, %s3220_s23 }
  0x98   : > { %2803 = vrot.lane.b32.xlu1 %v3334_v27, %s3220_s23  ;;  %2808 = vrot.lane.b32.xlu2 %v3338_v28, %s3220_s23 }
  0x9c   : > { %v301_v31 = vld [vmem:[#allocation2 + $0x10] sm:$0xff] }
  0x9d   : > { %v3349_v32 = vld [vmem:[#allocation2] sm:$0xff]  ;;  %v3352_v33 = vpack.i.bf16 %v301_v31, %v3347_v30 }
  0x9e   : > { %v3355_v34 = vpack.i.bf16 %v3349_v32, %v304_v29 }
  0xa0   : > { %2788 = vrot.lane.b32.xlu0 %v3355_v34, %s3220_s23  ;;  %2813 = vrot.lane.b32.xlu1 %v3352_v33, %s3220_s23 }
  0xa1   : > { %2818 = vrot.lane.b32.xlu2 %v3314_v17, %s3221_s24 }
  0xa8   : > { %2793 = vrot.lane.b32.xlu0 %v3330_v25, %s3221_s24  ;;  %2823 = vrot.lane.b32.xlu1 %v3334_v27, %s3221_s24 }
  0xa9   : > { %2828 = vrot.lane.b32.xlu2 %v3338_v28, %s3221_s24 }
  0xb0   : > { %2833 = vrot.lane.b32.xlu0 %v3355_v34, %s3221_s24  ;;  %2838 = vrot.lane.b32.xlu1 %v3352_v33, %s3221_s24 }
  0xb1   : > { %2848 = vrot.lane.b32.xlu2 %v3314_v17, %s3222_s25 }
  0xb8   : > { %2843 = vrot.lane.b32.xlu0 %v3330_v25, %s3222_s25  ;;  %2853 = vrot.lane.b32.xlu1 %v3334_v27, %s3222_s25 }
  0xb9   : > { %2858 = vrot.lane.b32.xlu2 %v3338_v28, %s3222_s25 }
  0xc0   : > { %2863 = vrot.lane.b32.xlu0 %v3355_v34, %s3222_s25  ;;  %2868 = vrot.lane.b32.xlu1 %v3352_v33, %s3222_s25 }
  0xc1   : > { %2908 = vrot.lane.b32.xlu2 %v3314_v17, %s3223_s26 }
  0xc8   : > { %2873 = vrot.lane.b32.xlu0 %v3330_v25, %s3223_s26  ;;  %2913 = vrot.lane.b32.xlu1 %v3334_v27, %s3223_s26 }
  0xc9   : > { %2918 = vrot.lane.b32.xlu2 %v3338_v28, %s3223_s26 }
  0xd0   : > { %2878 = vrot.lane.b32.xlu0 %v3355_v34, %s3223_s26  ;;  %2923 = vrot.lane.b32.xlu1 %v3352_v33, %s3223_s26 }
  0xd1   : > { %2928 = vrot.lane.b32.xlu2 %v3314_v17, %s3224_s27 }
  0xd8   : > { %2883 = vrot.lane.b32.xlu0 %v3330_v25, %s3224_s27  ;;  %2933 = vrot.lane.b32.xlu1 %v3334_v27, %s3224_s27 }
  0xd9   : > { %2938 = vrot.lane.b32.xlu2 %v3338_v28, %s3224_s27 }
  0xe0   : > { %2888 = vrot.lane.b32.xlu0 %v3355_v34, %s3224_s27  ;;  %2943 = vrot.lane.b32.xlu1 %v3352_v33, %s3224_s27 }
  0xe1   : > { %2948 = vrot.lane.b32.xlu2 %v3314_v17, %s3225_s30 }
  0xe8   : > { %2893 = vrot.lane.b32.xlu0 %v3330_v25, %s3225_s30  ;;  %2953 = vrot.lane.b32.xlu1 %v3334_v27, %s3225_s30 }
  0xe9   : > { %2958 = vrot.lane.b32.xlu2 %v3338_v28, %s3225_s30 }
  0xea   : > { %v2799_v36 = vpop.permute.xlu2 %2798 }
  0xeb   : > { %v2801_v37 = vunpack.i.h.bf16 %v2799_v36  ;;  %v2800_v38 = vunpack.i.l.bf16 %v2799_v36 }
  0xed   : > { %v435_v39 = vsel %vm428_vm4, %v2800_v38, %v2801_v37 }
  0xee   : > { %469 = vmatpush.msra.mxu2 %v435_v39 }
  0xf0   : > { %2898 = vrot.lane.b32.xlu0 %v3355_v34, %s3225_s30  ;;  %2963 = vrot.lane.b32.xlu1 %v3352_v33, %s3225_s30 }
  0xf1   : > { %2968 = vrot.lane.b32.xlu2 %v3314_v17, %s3226_s7 }
  0xf2   : > { %v2809_v41 = vpop.permute.xlu2 %2808 }
  0xf3   : > { %v2811_v53 = vunpack.i.h.bf16 %v2809_v41  ;;  %v2810_v54 = vunpack.i.l.bf16 %v2809_v41 }
  0xf5   : > { %v431_v61 = vsel %vm428_vm4, %v2810_v54, %v2811_v53 }
  0xf8   : > { %2903 = vrot.lane.b32.xlu0 %v3330_v25, %s3226_s7  ;;  %2973 = vrot.lane.b32.xlu1 %v3334_v27, %s3226_s7 }
  0xf9   : > { %2978 = vrot.lane.b32.xlu2 %v3338_v28, %s3226_s7  ;;  %v2554_v28 = vld [vmem:[%s4378_s1 + $0x28] sm:$0xff] }
  0xfb   : > { %v2819_v43 = vpop.permute.xlu2 %2818 }
  0xfc   : > { %v2821_v44 = vunpack.i.h.bf16 %v2819_v43  ;;  %v2820_v45 = vunpack.i.l.bf16 %v2819_v43  ;;  %v2577_v43 = vld [vmem:[%s4378_s1 + $0xe0] sm:$0xff] }
  0xfe   : > { %v551_v46 = vsel %vm544_vm5, %v2820_v45, %v2821_v44 }
  0xff   : > { %585 = vmatpush.msrb.mxu0 %v551_v46 }
 0x100   : > { %2983 = vrot.lane.b32.xlu0 %v3355_v34, %s3226_s7  ;;  %2988 = vrot.lane.b32.xlu1 %v3352_v33, %s3226_s7 }
 0x103   : > { %v3455_v48 = vpop.permute.xlu2 %2828 }
 0x104   : > { %v2831_v13 = vunpack.i.h.bf16 %v3455_v48  ;;  %v2830_v14 = vunpack.i.l.bf16 %v3455_v48 }
 0x106   : > { %v547_v34 = vsel %vm544_vm5, %v2830_v14, %v2831_v13 }
 0x109   : > { %v2784_v49 = vpop.permute.xlu0 %2783 }
 0x10a   : > { %v2786_v50 = vunpack.i.h.bf16 %v2784_v49  ;;  %v2785_v51 = vunpack.i.l.bf16 %v2784_v49  ;;  %v2804_v52 = vpop.permute.xlu1 %2803 }
 0x10b   : > { %v2806_v55 = vunpack.i.h.bf16 %v2804_v52  ;;  %v2805_v56 = vunpack.i.l.bf16 %v2804_v52  ;;  %v3457_v57 = vpop.permute.xlu2 %2848 }
 0x10c   : > { %v436_v58 = vsel %vm428_vm4, %v2801_v37, %v2785_v51  ;;  %v2851_v63 = vunpack.i.h.bf16 %v3457_v57  ;;  %v2850_v1 = vunpack.i.l.bf16 %v3457_v57 }
 0x10d   : > { %498 = vmatpush.msra.mxu3 %v436_v58  ;;  %v433_v59 = vsel %vm428_vm4, %v2786_v50, %v2805_v56  ;;  %v434_v60 = vsel %vm428_vm4, %v2805_v56, %v2806_v55  ;;  %v2556_v55 = vld [vmem:[%s4378_s1 + $0x38] sm:$0xff] }
 0x10e   : > { %470 = vmatpush.msra.mxu2 %v433_v59  ;;  %v687_v12 = vsel %vm680_vm6, %v2850_v1, %v2851_v63 }
 0x10f   : > { %499 = vmatpush.msra.mxu3 %v434_v60 }
 0x110   : > { %471 = vmatpush.msra.mxu2 %v431_v61 }
 0x112   : > { %v2789_v62 = vpop.permute.xlu0 %2788  ;;  %v2814_v2 = vpop.permute.xlu1 %2813 }
 0x113   : > { %v2791_v3 = vunpack.i.h.bf16 %v2789_v62  ;;  %v2790_v4 = vunpack.i.l.bf16 %v2789_v62  ;;  %v2816_v5 = vunpack.i.h.bf16 %v2814_v2  ;;  %v2815_v6 = vunpack.i.l.bf16 %v2814_v2  ;;  %v3465_v7 = vpop.permute.xlu2 %2858 }
 0x114   : > { %v2861_v56 = vunpack.i.h.bf16 %v3465_v7 }
 0x115   : > { %v432_v9 = vsel %vm428_vm4, %v2811_v53, %v2790_v4  ;;  %v429_v10 = vsel %vm428_vm4, %v2791_v3, %v2815_v6  ;;  %v430_v11 = vsel %vm428_vm4, %v2815_v6, %v2816_v5  ;;  %v2589_v5 = vld [vmem:[%s4378_s1 + $0x60] sm:$0xff]  ;;  %v2579_v6 = vld [vmem:[%s4378_s1 + $0xf0] sm:$0xff] }
 0x116   : > { %500 = vmatpush.msra.mxu3 %v432_v9  ;;  %472 = vmatpush.msra.mxu2 %v429_v10 }
 0x117   : > { %2569 = vmatmul.msk.f32.vlgmr.msra.gmra.mxu2 %vm321_vm3, %v2553_v8 }
 0x118   : > { %501 = vmatpush.msra.mxu3 %v430_v11  ;;  %721 = vmatpush.msrb.mxu2 %v687_v12 }
 0x119   : > { %2573 = vmatmul.msk.f32.vlgmr.msra.gmra.mxu3 %vm321_vm3, %v2553_v8 }
 0x11a   : > { %v2794_v17 = vpop.permute.xlu0 %2793  ;;  %v2824_v20 = vpop.permute.xlu1 %2823 }
 0x11b   : > { %v2796_v21 = vunpack.i.h.bf16 %v2794_v17  ;;  %v2795_v23 = vunpack.i.l.bf16 %v2794_v17  ;;  %v2826_v25 = vunpack.i.h.bf16 %v2824_v20  ;;  %v2825_v26 = vunpack.i.l.bf16 %v2824_v20  ;;  %v3480_v27 = vpop.permute.xlu2 %2908 }
 0x11c   : > { %v2910_v59 = vunpack.i.l.bf16 %v3480_v27 }
 0x11d   : > { %v552_v29 = vsel %vm544_vm5, %v2821_v44, %v2795_v23  ;;  %v549_v31 = vsel %vm544_vm5, %v2796_v21, %v2825_v26  ;;  %v550_v33 = vsel %vm544_vm5, %v2825_v26, %v2826_v25  ;;  %v2590_v26 = vld [vmem:[%s4378_s1 + $0x68] sm:$0xff] }
 0x11e   : > { %614 = vmatpush.msrb.mxu1 %v552_v29  ;;  %586 = vmatpush.msrb.mxu0 %v549_v31 }
 0x11f   : > { %2570 = vmatmul.msk.f32.gmra.mxu2 %vm321_vm3, %v2554_v28 }
 0x120   : > { %615 = vmatpush.msrb.mxu1 %v550_v33  ;;  %587 = vmatpush.msrb.mxu0 %v547_v34 }
 0x121   : > { %2574 = vmatmul.msk.f32.gmra.mxu3 %vm321_vm3, %v2554_v28 }
 0x122   : > { %v2834_v35 = vpop.permute.xlu0 %2833  ;;  %v2839_v36 = vpop.permute.xlu1 %2838 }
 0x123   : > { %v2836_v37 = vunpack.i.h.bf16 %v2834_v35  ;;  %v2835_v38 = vunpack.i.l.bf16 %v2834_v35  ;;  %v2841_v39 = vunpack.i.h.bf16 %v2839_v36  ;;  %v2840_v40 = vunpack.i.l.bf16 %v2839_v36  ;;  %v3491_v41 = vpop.permute.xlu2 %2918 }
 0x124   : > { %v2921_v20 = vunpack.i.h.bf16 %v3491_v41  ;;  %v2920_v21 = vunpack.i.l.bf16 %v3491_v41 }
 0x125   : > { %v548_v44 = vsel %vm544_vm5, %v2831_v13, %v2835_v38  ;;  %v545_v45 = vsel %vm544_vm5, %v2836_v37, %v2840_v40  ;;  %v546_v46 = vsel %vm544_vm5, %v2840_v40, %v2841_v39 }
 0x126   : > { %616 = vmatpush.msrb.mxu1 %v548_v44  ;;  %588 = vmatpush.msrb.mxu0 %v545_v45  ;;  %v869_v29 = vsel %vm866_vm8, %v2920_v21, %v2921_v20  ;;  %v647_v44 = vld [vmem:[%s4378_s1] sm:$0xff]  ;;  %v650_v21 = vld [vmem:[%s4378_s1 + $0x18] sm:$0xff] }
 0x127   : > { %2571 = vmatmul.msk.f32.gmra.mxu2 %vm321_vm3, %v2555_v42  ;;  %2581 = vmatmul.msk.f32.vlgmr.msrb.gmra.mxu0 %vm321_vm3, %v2577_v43 }
 0x128   : > { %617 = vmatpush.msrb.mxu1 %v546_v46  ;;  %791 = vmatpush.msra.mxu0 %v3305_v15 }
 0x129   : > { %2575 = vmatmul.msk.f32.gmra.mxu3 %vm321_vm3, %v2555_v42  ;;  %2585 = vmatmul.msk.f32.vlgmr.msrb.gmra.mxu1 %vm321_vm3, %v2577_v43  ;;  %v2591_v42 = vld [vmem:[%s4378_s1 + $0x70] sm:$0xff] }
 0x12a   : > { %820 = vmatpush.msra.mxu1 %v3308_v16  ;;  %v2844_v47 = vpop.permute.xlu0 %2843  ;;  %792 = vmatpush.msra.mxu0 %v3323_v22  ;;  %v2854_v48 = vpop.permute.xlu1 %2853 }
 0x12b   : > { %v2846_v49 = vunpack.i.h.bf16 %v2844_v47  ;;  %v2845_v50 = vunpack.i.l.bf16 %v2844_v47  ;;  %v2855_v51 = vunpack.i.l.bf16 %v2854_v48  ;;  %v3509_v52 = vpop.permute.xlu2 %2928  ;;  %v2856_v53 = vunpack.i.h.bf16 %v2854_v48 }
 0x12c   : > { %821 = vmatpush.msra.mxu1 %v3326_v24  ;;  %793 = vmatpush.msra.mxu0 %v3321_v19  ;;  %v2931_v15 = vunpack.i.h.bf16 %v3509_v52  ;;  %v2930_v54 = vunpack.i.l.bf16 %v3509_v52  ;;  %v2860_v24 = vunpack.i.l.bf16 %v3465_v7  ;;  %v2578_v19 = vld [vmem:[%s4378_s1 + $0xe8] sm:$0xff] }
 0x12d   : > { %v688_v16 = vsel %vm680_vm6, %v2851_v63, %v2845_v50  ;;  %v685_v22 = vsel %vm680_vm6, %v2846_v49, %v2855_v51  ;;  %v686_v57 = vsel %vm680_vm6, %v2855_v51, %v2856_v53 }
 0x12e   : > { %822 = vmatpush.msra.mxu1 %v3319_v18  ;;  %750 = vmatpush.msrb.mxu3 %v688_v16  ;;  %v1018_v58 = vsel %vm1011_vm7, %v2930_v54, %v2931_v15  ;;  %v2911_v18 = vunpack.i.h.bf16 %v3480_v27  ;;  %v2580_v27 = vld [vmem:[%s4378_s1 + $0xf8] sm:$0xff] }
 0x12f   : > { %794 = vmatpush.msra.mxu0 %v3349_v32  ;;  %722 = vmatpush.msrb.mxu2 %v685_v22  ;;  %v2592_v22 = vld [vmem:[%s4378_s1 + $0x78] sm:$0xff] }
 0x130   : > { %823 = vmatpush.msra.mxu1 %v3347_v30  ;;  %2572 = vmatmul.msk.f32.gmra.mxu2 %vm321_vm3, %v2556_v55  ;;  %v683_v30 = vsel %vm680_vm6, %v2860_v24, %v2861_v56  ;;  %v873_v7 = vsel %vm866_vm8, %v2910_v59, %v2911_v18  ;;  %v648_v24 = vld [vmem:[%s4378_s1 + $0x8] sm:$0xff] }
 0x131   : > { %2582 = vmatmul.msk.f32.gmra.mxu0 %vm321_vm3, %v2578_v19  ;;  %751 = vmatpush.msrb.mxu3 %v686_v57 }
 0x132   : > { %2576 = vmatmul.msk.f32.gmra.mxu3 %vm321_vm3, %v2556_v55  ;;  %2586 = vmatmul.msk.f32.gmra.mxu1 %vm321_vm3, %v2578_v19  ;;  %v2864_v32 = vpop.permute.xlu0 %2863  ;;  %v2869_v60 = vpop.permute.xlu1 %2868 }
 0x133   : > { %723 = vmatpush.msrb.mxu2 %v683_v30  ;;  %v2866_v61 = vunpack.i.h.bf16 %v2864_v32  ;;  %v2865_v62 = vunpack.i.l.bf16 %v2864_v32  ;;  %v2871_v63 = vunpack.i.h.bf16 %v2869_v60  ;;  %v2870_v1 = vunpack.i.l.bf16 %v2869_v60  ;;  %1052 = vmatpush.msrb.mxu0 %v1018_v58  ;;  %v3541_v2 = vpop.permute.xlu2 %2938 }
 0x134   : > { %v2941_v55 = vunpack.i.h.bf16 %v3541_v2 }
 0x135   : > { %v684_v3 = vsel %vm680_vm6, %v2861_v56, %v2865_v62  ;;  %v681_v4 = vsel %vm680_vm6, %v2866_v61, %v2870_v1  ;;  %v682_v8 = vsel %vm680_vm6, %v2870_v1, %v2871_v63  ;;  %v2940_v56 = vunpack.i.l.bf16 %v3541_v2  ;;  %v2609_v1 = vld [vmem:[%s4378_s1 + $0xc0] sm:$0xff]  ;;  %v649_v2 = vld [vmem:[%s4378_s1 + $0x10] sm:$0xff] }
 0x136   : > { %752 = vmatpush.msrb.mxu3 %v684_v3  ;;  %724 = vmatpush.msrb.mxu2 %v681_v4 }
 0x138   : > { %907 = vmatpush.msra.mxu2 %v873_v7  ;;  %753 = vmatpush.msrb.mxu3 %v682_v8 }
 0x139   : > { %2593 = vmatmul.msk.f32.vlgmr.msrb.gmra.mxu2 %vm321_vm3, %v2589_v5  ;;  %2583 = vmatmul.msk.f32.gmra.mxu0 %vm321_vm3, %v2579_v6 }
 0x13a   : > { %2587 = vmatmul.msk.f32.gmra.mxu1 %vm321_vm3, %v2579_v6  ;;  %2597 = vmatmul.msk.f32.vlgmr.msrb.gmra.mxu3 %vm321_vm3, %v2589_v5  ;;  %v2874_v9 = vpop.permute.xlu0 %2873  ;;  %v2914_v10 = vpop.permute.xlu1 %2913 }
 0x13b   : > { %v2876_v11 = vunpack.i.h.bf16 %v2874_v9  ;;  %v2875_v12 = vunpack.i.l.bf16 %v2874_v9  ;;  %v2916_v13 = vunpack.i.h.bf16 %v2914_v10  ;;  %v2915_v14 = vunpack.i.l.bf16 %v2914_v10  ;;  %v3557_v17 = vpop.permute.xlu2 %2948 }
 0x13c   : > { %v2951_v33 = vunpack.i.h.bf16 %v3557_v17  ;;  %v2950_v34 = vunpack.i.l.bf16 %v3557_v17 }
 0x13d   : > { %v874_v23 = vsel %vm866_vm8, %v2911_v18, %v2875_v12  ;;  %v871_v25 = vsel %vm866_vm8, %v2876_v11, %v2915_v14  ;;  %v872_v28 = vsel %vm866_vm8, %v2915_v14, %v2916_v13 }
 0x13e   : > { %936 = vmatpush.msra.mxu3 %v874_v23  ;;  %908 = vmatpush.msra.mxu2 %v871_v25  ;;  %v1129_v45 = vsel %vm1122_vm9, %v2950_v34, %v2951_v33 }
 0x140   : > { %937 = vmatpush.msra.mxu3 %v872_v28  ;;  %909 = vmatpush.msra.mxu2 %v869_v29 }
 0x141   : > { %2594 = vmatmul.msk.f32.gmra.mxu2 %vm321_vm3, %v2590_v26  ;;  %2584 = vmatmul.msk.f32.gmra.mxu0 %vm321_vm3, %v2580_v27 }
 0x142   : > { %2588 = vmatmul.msk.f32.gmra.mxu1 %vm321_vm3, %v2580_v27  ;;  %2598 = vmatmul.msk.f32.gmra.mxu3 %vm321_vm3, %v2590_v26  ;;  %v2879_v31 = vpop.permute.xlu0 %2878  ;;  %v2924_v35 = vpop.permute.xlu1 %2923 }
 0x143   : > { %v2881_v36 = vunpack.i.h.bf16 %v2879_v31  ;;  %v2880_v37 = vunpack.i.l.bf16 %v2879_v31  ;;  %v2926_v38 = vunpack.i.h.bf16 %v2924_v35  ;;  %v2925_v39 = vunpack.i.l.bf16 %v2924_v35  ;;  %v3582_v43 = vpop.permute.xlu2 %2958  ;;  %v2611_v35 = vld [vmem:[%s4378_s1 + $0xd0] sm:$0xff] }
 0x144   : > { %v2961_v11 = vunpack.i.h.bf16 %v3582_v43  ;;  %v2960_v12 = vunpack.i.l.bf16 %v3582_v43 }
 0x145   : > { %v870_v40 = vsel %vm866_vm8, %v2921_v20, %v2880_v37  ;;  %v867_v41 = vsel %vm866_vm8, %v2881_v36, %v2925_v39  ;;  %v868_v46 = vsel %vm866_vm8, %v2925_v39, %v2926_v38  ;;  %v2610_v20 = vld [vmem:[%s4378_s1 + $0xc8] sm:$0xff]  ;;  %v2625_v36 = vld [vmem:[%s4378_s1 + $0xa0] sm:$0xff] }
 0x146   : > { %938 = vmatpush.msra.mxu3 %v870_v40  ;;  %910 = vmatpush.msra.mxu2 %v867_v41  ;;  %v1125_v17 = vsel %vm1122_vm9, %v2960_v12, %v2961_v11 }
 0x148   : > { %1163 = vmatpush.msrb.mxu2 %v1129_v45  ;;  %939 = vmatpush.msra.mxu3 %v868_v46 }
 0x149   : > { %2595 = vmatmul.msk.f32.gmra.mxu2 %vm321_vm3, %v2591_v42  ;;  %2601 = vmatmul.msk.f32.vlgmr.msra.gmra.mxu0 %vm321_vm3, %v647_v44 }
 0x14a   : > { %2599 = vmatmul.msk.f32.gmra.mxu3 %vm321_vm3, %v2591_v42  ;;  %2605 = vmatmul.msk.f32.vlgmr.msra.gmra.mxu1 %vm321_vm3, %v647_v44  ;;  %v2884_v47 = vpop.permute.xlu0 %2883  ;;  %v2934_v48 = vpop.permute.xlu1 %2933 }
 0x14b   : > { %v2886_v49 = vunpack.i.h.bf16 %v2884_v47  ;;  %v2885_v50 = vunpack.i.l.bf16 %v2884_v47  ;;  %v2936_v51 = vunpack.i.h.bf16 %v2934_v48  ;;  %v2935_v53 = vunpack.i.l.bf16 %v2934_v48  ;;  %v3608_v19 = vpop.permute.xlu2 %2968  ;;  %v2612_v47 = vld [vmem:[%s4378_s1 + $0xd8] sm:$0xff] }
 0x14c   : > { %v2971_v58 = vunpack.i.h.bf16 %v3608_v19  ;;  %v2970_v18 = vunpack.i.l.bf16 %v3608_v19 }
 0x14d   : > { %v1019_v54 = vsel %vm1011_vm7, %v2931_v15, %v2885_v50  ;;  %v1016_v16 = vsel %vm1011_vm7, %v2886_v49, %v2935_v53  ;;  %v1017_v52 = vsel %vm1011_vm7, %v2935_v53, %v2936_v51  ;;  %v1014_v15 = vsel %vm1011_vm7, %v2940_v56, %v2941_v55  ;;  %v2626_v50 = vld [vmem:[%s4378_s1 + $0xa8] sm:$0xff] }
 0x14e   : > { %1081 = vmatpush.msrb.mxu1 %v1019_v54  ;;  %1053 = vmatpush.msrb.mxu0 %v1016_v16  ;;  %v1245_v3 = vsel %vm1238_vm10, %v2970_v18, %v2971_v58  ;;  %v3693_v18 = vpop.f32.mrf.mxu0 }
 0x150   : > { %1082 = vmatpush.msrb.mxu1 %v1017_v52  ;;  %1054 = vmatpush.msrb.mxu0 %v1014_v15  ;;  %v2621_v15 = vld [vmem:[%s4378_s1 + $0x40] sm:$0xff] }
 0x151   : > { %2596 = vmatmul.msk.f32.gmra.mxu2 %vm321_vm3, %v2592_v22  ;;  %2602 = vmatmul.msk.f32.gmra.mxu0 %vm321_vm3, %v648_v24 }
 0x152   : > { %2600 = vmatmul.msk.f32.gmra.mxu3 %vm321_vm3, %v2592_v22  ;;  %2606 = vmatmul.msk.f32.gmra.mxu1 %vm321_vm3, %v648_v24  ;;  %v2889_v57 = vpop.permute.xlu0 %2888  ;;  %v2944_v59 = vpop.permute.xlu1 %2943 }
 0x153   : > { %v2891_v30 = vunpack.i.h.bf16 %v2889_v57  ;;  %v2890_v32 = vunpack.i.l.bf16 %v2889_v57  ;;  %v2946_v60 = vunpack.i.h.bf16 %v2944_v59  ;;  %v2945_v61 = vunpack.i.l.bf16 %v2944_v59  ;;  %v2979_v40 = vpop.permute.xlu2 %2978  ;;  %v2627_v57 = vld [vmem:[%s4378_s1 + $0xb0] sm:$0xff]  ;;  %v2622_v59 = vld [vmem:[%s4378_s1 + $0x48] sm:$0xff] }
 0x154   : > { %v2981_v48 = vunpack.i.h.bf16 %v2979_v40  ;;  %v2980_v49 = vunpack.i.l.bf16 %v2979_v40 }
 0x155   : > { %v1015_v62 = vsel %vm1011_vm7, %v2941_v55, %v2890_v32  ;;  %v1012_v63 = vsel %vm1011_vm7, %v2891_v30, %v2945_v61  ;;  %v1013_v4 = vsel %vm1011_vm7, %v2945_v61, %v2946_v60  ;;  %v2628_v30 = vld [vmem:[%s4378_s1 + $0xb8] sm:$0xff]  ;;  %v3701_v32 = vpop.f32.mrf.mxu1  ;;  %v2623_v60 = vld [vmem:[%s4378_s1 + $0x50] sm:$0xff]  ;;  %v2645_v61 = vld [vmem:[%s4378_s1 + $0x100] sm:$0xff] }
 0x156   : > { %1083 = vmatpush.msrb.mxu1 %v1015_v62  ;;  %1055 = vmatpush.msrb.mxu0 %v1012_v63  ;;  %v1241_v53 = vsel %vm1238_vm10, %v2980_v49, %v2981_v48  ;;  %v3713_v62 = vpop.f32.mrf.mxu0 }
 0x158   : > { %1279 = vmatpush.msra.mxu0 %v1245_v3  ;;  %1084 = vmatpush.msrb.mxu1 %v1013_v4 }
 0x159   : > { %2613 = vmatmul.msk.f32.vlgmr.msra.gmra.mxu2 %vm321_vm3, %v2609_v1  ;;  %2603 = vmatmul.msk.f32.gmra.mxu0 %vm321_vm3, %v649_v2 }
 0x15a   : > { %2607 = vmatmul.msk.f32.gmra.mxu1 %vm321_vm3, %v649_v2  ;;  %2617 = vmatmul.msk.f32.vlgmr.msra.gmra.mxu3 %vm321_vm3, %v2609_v1  ;;  %v2894_v5 = vpop.permute.xlu0 %2893  ;;  %v2954_v6 = vpop.permute.xlu1 %2953  ;;  %v2624_v1 = vld [vmem:[%s4378_s1 + $0x58] sm:$0xff]  ;;  %v2646_v2 = vld [vmem:[%s4378_s1 + $0x108] sm:$0xff] }
 0x15b   : > { %v2896_v7 = vunpack.i.h.bf16 %v2894_v5  ;;  %v2895_v8 = vunpack.i.l.bf16 %v2894_v5  ;;  %v2956_v9 = vunpack.i.h.bf16 %v2954_v6  ;;  %v2955_v10 = vunpack.i.l.bf16 %v2954_v6  ;;  %v2647_v5 = vld [vmem:[%s4378_s1 + $0x110] sm:$0xff] }
 0x15d   : > { %v1130_v13 = vsel %vm1122_vm9, %v2951_v33, %v2895_v8  ;;  %v1127_v14 = vsel %vm1122_vm9, %v2896_v7, %v2955_v10  ;;  %v1128_v23 = vsel %vm1122_vm9, %v2955_v10, %v2956_v9  ;;  %v3716_v63 = vpop.f32.mrf.mxu1  ;;  %v2648_v10 = vld [vmem:[%s4378_s1 + $0x118] sm:$0xff] }
 0x15e   : > { %1192 = vmatpush.msrb.mxu3 %v1130_v13  ;;  %1164 = vmatpush.msrb.mxu2 %v1127_v14  ;;  %v3728_v3 = vpop.f32.mrf.mxu0 }
 0x160   : > { %1193 = vmatpush.msrb.mxu3 %v1128_v23  ;;  %1165 = vmatpush.msrb.mxu2 %v1125_v17 }
 0x161   : > { %2614 = vmatmul.msk.f32.gmra.mxu2 %vm321_vm3, %v2610_v20  ;;  %2604 = vmatmul.msk.f32.gmra.mxu0 %vm321_vm3, %v650_v21 }
 0x162   : > { %2608 = vmatmul.msk.f32.gmra.mxu1 %vm321_vm3, %v650_v21  ;;  %2618 = vmatmul.msk.f32.gmra.mxu3 %vm321_vm3, %v2610_v20  ;;  %v2899_v25 = vpop.permute.xlu0 %2898  ;;  %v2964_v26 = vpop.permute.xlu1 %2963 }
 0x163   : > { %v2901_v27 = vunpack.i.h.bf16 %v2899_v25  ;;  %v2900_v28 = vunpack.i.l.bf16 %v2899_v25  ;;  %v2966_v29 = vunpack.i.h.bf16 %v2964_v26  ;;  %v2965_v31 = vunpack.i.l.bf16 %v2964_v26 }
 0x165   : > { %v1126_v33 = vsel %vm1122_vm9, %v2961_v11, %v2900_v28  ;;  %v1123_v34 = vsel %vm1122_vm9, %v2901_v27, %v2965_v31  ;;  %v1124_v37 = vsel %vm1122_vm9, %v2965_v31, %v2966_v29  ;;  %v3733_v4 = vpop.f32.mrf.mxu1 }
 0x166   : > { %1194 = vmatpush.msrb.mxu3 %v1126_v33  ;;  %1166 = vmatpush.msrb.mxu2 %v1123_v34  ;;  %v3742_v7 = vpop.f32.mrf.mxu0 }
 0x168   : > { %1195 = vmatpush.msrb.mxu3 %v1124_v37 }
 0x169   : > { %2615 = vmatmul.msk.f32.gmra.mxu2 %vm321_vm3, %v2611_v35  ;;  %2629 = vmatmul.msk.f32.vlgmr.msrb.gmra.mxu0 %vm321_vm3, %v2625_v36 }
 0x16a   : > { %2619 = vmatmul.msk.f32.gmra.mxu3 %vm321_vm3, %v2611_v35  ;;  %2633 = vmatmul.msk.f32.vlgmr.msrb.gmra.mxu1 %vm321_vm3, %v2625_v36  ;;  %v2904_v38 = vpop.permute.xlu0 %2903  ;;  %v2974_v39 = vpop.permute.xlu1 %2973 }
 0x16b   : > { %v2906_v41 = vunpack.i.h.bf16 %v2904_v38  ;;  %v2905_v42 = vunpack.i.l.bf16 %v2904_v38  ;;  %v2976_v43 = vunpack.i.h.bf16 %v2974_v39  ;;  %v2975_v44 = vunpack.i.l.bf16 %v2974_v39 }
 0x16d   : > { %v1246_v45 = vsel %vm1238_vm10, %v2971_v58, %v2905_v42  ;;  %v1243_v46 = vsel %vm1238_vm10, %v2906_v41, %v2975_v44  ;;  %v1244_v51 = vsel %vm1238_vm10, %v2975_v44, %v2976_v43  ;;  %v3746_v9 = vpop.f32.mrf.mxu1 }
 0x16e   : > { %1308 = vmatpush.msra.mxu1 %v1246_v45  ;;  %1280 = vmatpush.msra.mxu0 %v1243_v46 }
 0x170   : > { %1309 = vmatpush.msra.mxu1 %v1244_v51  ;;  %1281 = vmatpush.msra.mxu0 %v1241_v53 }
 0x171   : > { %2616 = vmatmul.msk.f32.gmra.mxu2 %vm321_vm3, %v2612_v47  ;;  %2630 = vmatmul.msk.f32.gmra.mxu0 %vm321_vm3, %v2626_v50 }
 0x172   : > { %2620 = vmatmul.msk.f32.gmra.mxu3 %vm321_vm3, %v2612_v47  ;;  %2634 = vmatmul.msk.f32.gmra.mxu1 %vm321_vm3, %v2626_v50  ;;  %v2984_v54 = vpop.permute.xlu0 %2983  ;;  %v2989_v16 = vpop.permute.xlu1 %2988 }
 0x173   : > { %v2986_v22 = vunpack.i.h.bf16 %v2984_v54  ;;  %v2985_v55 = vunpack.i.l.bf16 %v2984_v54  ;;  %v2991_v56 = vunpack.i.h.bf16 %v2989_v16  ;;  %v2990_v24 = vunpack.i.l.bf16 %v2989_v16 }
 0x175   : > { %v1242_v52 = vsel %vm1238_vm10, %v2981_v48, %v2985_v55  ;;  %v1239_v19 = vsel %vm1238_vm10, %v2986_v22, %v2990_v24  ;;  %v1240_v58 = vsel %vm1238_vm10, %v2990_v24, %v2991_v56 }
 0x176   : > { %1310 = vmatpush.msra.mxu1 %v1242_v52  ;;  %1282 = vmatpush.msra.mxu0 %v1239_v19 }
 0x178   : > { %1311 = vmatpush.msra.mxu1 %v1240_v58 }
 0x179   : > { %2637 = vmatmul.msk.f32.vlgmr.msrb.gmra.mxu2 %vm321_vm3, %v2621_v15  ;;  %2631 = vmatmul.msk.f32.gmra.mxu0 %vm321_vm3, %v2627_v57 }
 0x17a   : > { %2635 = vmatmul.msk.f32.gmra.mxu1 %vm321_vm3, %v2627_v57  ;;  %2641 = vmatmul.msk.f32.vlgmr.msrb.gmra.mxu3 %vm321_vm3, %v2621_v15 }
 0x181   : > { %2638 = vmatmul.msk.f32.gmra.mxu2 %vm321_vm3, %v2622_v59  ;;  %2632 = vmatmul.msk.f32.gmra.mxu0 %vm321_vm3, %v2628_v30 }
 0x182   : > { %2636 = vmatmul.msk.f32.gmra.mxu1 %vm321_vm3, %v2628_v30  ;;  %2642 = vmatmul.msk.f32.gmra.mxu3 %vm321_vm3, %v2622_v59  ;;  %v207_v59 = vlaneseq }
 0x189   : > { %2639 = vmatmul.msk.f32.gmra.mxu2 %vm321_vm3, %v2623_v60  ;;  %2649 = vmatmul.msk.f32.vlgmr.msra.gmra.mxu0 %vm321_vm3, %v2645_v61 }
 0x18a   : > { %2643 = vmatmul.msk.f32.gmra.mxu3 %vm321_vm3, %v2623_v60  ;;  %2653 = vmatmul.msk.f32.vlgmr.msra.gmra.mxu1 %vm321_vm3, %v2645_v61 }
 0x191   : > { %2640 = vmatmul.msk.f32.gmra.mxu2 %vm321_vm3, %v2624_v1  ;;  %2650 = vmatmul.msk.f32.gmra.mxu0 %vm321_vm3, %v2646_v2 }
 0x192   : > { %2644 = vmatmul.msk.f32.gmra.mxu3 %vm321_vm3, %v2624_v1  ;;  %2654 = vmatmul.msk.f32.gmra.mxu1 %vm321_vm3, %v2646_v2  ;;  %v208_v1 = vand.u32 127, %v207_v59 }
 0x194   : > { %v214_v2 = vand.u32 15, %v208_v1 }
 0x196   : > { %vm224_vm11 = vcmp.ne.s32.totalorder %v214_v2, 0  ;;  %vm230_vm12 = vcmp.ne.s32.totalorder %v214_v2, 15 }
 0x199   : > { %2651 = vmatmul.msk.f32.gmra.mxu0 %vm321_vm3, %v2647_v5 }
 0x19a   : > { %2655 = vmatmul.msk.f32.gmra.mxu1 %vm321_vm3, %v2647_v5  ;;  %v3740_v6 = vpop.f32.mrf.mxu2 }
 0x19c   : > { %v3744_v8 = vpop.f32.mrf.mxu3 }
 0x1a1   : > { %2652 = vmatmul.msk.f32.gmra.mxu0 %vm321_vm3, %v2648_v10 }
 0x1a2   : > { %2656 = vmatmul.msk.f32.gmra.mxu1 %vm321_vm3, %v2648_v10  ;;  %v477_v11 = vpop.f32.mrf.mxu2 }
 0x1a4   : > { %v3753_v12 = vpop.f32.mrf.mxu3  ;;  %v3755_v13 = vpop.f32.mrf.mxu0 }
 0x1a5   : > { %4384 = vst [vmem:[#allocation4_spill] sm:$0xff] %v3755_v13 }
 0x1a6   : > { %v3757_v14 = vpop.f32.mrf.mxu1 }
 0x1a7   : > { %4385 = vst [vmem:[#allocation5_spill] sm:$0xff] %v3757_v14 }
 0x1aa   : > { %v3759_v20 = vpop.f32.mrf.mxu2 }
 0x1ac   : > { %v3761_v21 = vpop.f32.mrf.mxu3 }
 0x1ae   : > { %v3763_v23 = vpop.f32.mrf.mxu0 }
 0x1af   : > { %v3765_v17 = vpop.f32.mrf.mxu1 }
 0x1b3   : > { %v3767_v25 = vpop.f32.mrf.mxu2 }
 0x1b5   : > { %v3769_v26 = vpop.f32.mrf.mxu3 }
 0x1b6   : > { %v3771_v27 = vpop.f32.mrf.mxu0 }
 0x1b7   : > { %v3773_v28 = vpop.f32.mrf.mxu1 }
 0x1bc   : > { %v3775_v29 = vpop.f32.mrf.mxu2 }
 0x1bd   : > { %v3777_v31 = vpop.f32.mrf.mxu3 }
 0x1be   : > { %v3779_v33 = vpop.f32.mrf.mxu0 }
 0x1bf   : > { %v3781_v34 = vpop.f32.mrf.mxu1 }
 0x1c0   : > { %4386 = vst [vmem:[#allocation6_spill] sm:$0xff] %v3781_v34  ;;  %v209_v34 = vadd.s32 128, %v208_v1 }
 0x1c4   : > { %v729_v35 = vpop.f32.mrf.mxu2 }
 0x1c5   : > { %v3783_v36 = vpop.f32.mrf.mxu3 }
 0x1c6   : > { %v3785_v37 = vpop.f32.mrf.mxu0 }
 0x1c7   : > { %v3787_v38 = vpop.f32.mrf.mxu1 }
 0x1cc   : > { %v732_v39 = vpop.f32.mrf.mxu2 }
 0x1cd   : > { %v761_v40 = vpop.f32.mrf.mxu3 }
 0x1ce   : > { %v799_v41 = vpop.f32.mrf.mxu0 }
 0x1cf   : > { %v828_v42 = vpop.f32.mrf.mxu1  ;;  %v800_v0 = vadd.f32 %v799_v41, %v729_v35  ;;  %v3830_v35 = vadd.f32 %v3740_v6, %v3693_v18  ;;  %v3834_v41 = vadd.f32 %v3744_v8, %v3701_v32 }
 0x1d4   : > { %v3789_v43 = vpop.f32.mrf.mxu2 }
 0x1d5   : > { %v3791_v44 = vpop.f32.mrf.mxu3 }
 0x1d6   : > { %v802_v45 = vpop.f32.mrf.mxu0 }
 0x1d7   : > { %v831_v46 = vpop.f32.mrf.mxu1 }
 0x1d8   : > { %v832_v6 = vadd.f32 %v831_v46, %v761_v40  ;;  %v797_v46 = vadd.f32 %v3785_v37, %v3775_v29 }
 0x1dc   : > { %v3793_v47 = vpop.f32.mrf.mxu2 }
 0x1dd   : > { %v3795_v48 = vpop.f32.mrf.mxu3 }
 0x1de   : > { %v3797_v49 = vpop.f32.mrf.mxu0 }
 0x1df   : > { %v3799_v50 = vpop.f32.mrf.mxu1 }
 0x1e4   : > { %v915_v51 = vpop.f32.mrf.mxu2 }
 0x1e5   : > { %v944_v53 = vpop.f32.mrf.mxu3 }
 0x1e6   : > { %v3801_v54 = vpop.f32.mrf.mxu0 }
 0x1e7   : > { %4387 = vst [vmem:[#allocation7_spill] sm:$0xff] %v3801_v54  ;;  %v3803_v16 = vpop.f32.mrf.mxu1 }
 0x1e8   : > { %4388 = vst [vmem:[#allocation8_spill] sm:$0xff] %v3803_v16  ;;  %v955_v16 = vadd.f32 %v915_v51, %v800_v0  ;;  %v507_v0 = vadd.f32 %v3753_v12, %v3716_v63  ;;  %v829_v12 = vadd.f32 %v828_v42, %v3783_v36 }
 0x1ea   : > { %v634_v63 = vadd.f32 %v3765_v17, %v507_v0  ;;  %v956_v36 = vadd.f32 %v944_v53, %v829_v12 }
 0x1ec   : > { %v918_v22 = vpop.f32.mrf.mxu2 }
 0x1ed   : > { %v947_v55 = vpop.f32.mrf.mxu3 }
 0x1ee   : > { %v1060_v56 = vpop.f32.mrf.mxu0  ;;  %v958_v40 = vadd.f32 %v947_v55, %v832_v6  ;;  %v4394_v0 = vld [vmem:[#allocation7_spill] sm:$0xff] }
 0x1ef   : > { %v1089_v24 = vpop.f32.mrf.mxu1 }
 0x1f4   : > { %v3805_v52 = vpop.f32.mrf.mxu2 }
 0x1f5   : > { %v3807_v19 = vpop.f32.mrf.mxu3 }
 0x1f6   : > { %v1063_v15 = vpop.f32.mrf.mxu0 }
 0x1f7   : > { %v1092_v57 = vpop.f32.mrf.mxu1 }
 0x1fc   : > { %v3809_v58 = vpop.f32.mrf.mxu2 }
 0x1fd   : > { %4389 = vst [vmem:[#allocation9_spill] sm:$0xff] %v3809_v58  ;;  %v3811_v30 = vpop.f32.mrf.mxu3  ;;  %v4393_v58 = vmov 0.0  }
 0x1fe   : > { %4390 = vst [vmem:[#allocation10_spill] sm:$0xff] %v3811_v30  ;;  %v3813_v60 = vpop.f32.mrf.mxu0  ;;  %v3822_v54 = vsel %vm224_vm11, 1.0, %v4393_v58  ;;  %v221_v30 = vand.u32 15, %v209_v34  ;;  %v803_v34 = vadd.f32 %v802_v45, %v732_v39  ;;  %v3844_v32 = vsel %vm230_vm12, 1.0, %v4393_v58 }
 0x1ff   : > { %4391 = vst [vmem:[#allocation11_spill] sm:$0xff] %v3813_v60  ;;  %v3815_v61 = vpop.f32.mrf.mxu1  ;;  %v963_v59 = vmul.f32 %v3822_v54, %v955_v16 }
 0x200   : > { %4392 = vst [vmem:[#allocation12_spill] sm:$0xff] %v3815_v61  ;;  %v478_v61 = vadd.f32 %v477_v11, %v3713_v62  ;;  %v481_v62 = vadd.f32 %v3759_v20, %v3728_v3  ;;  %v510_v11 = vadd.f32 %v3761_v21, %v3733_v4  ;;  %vm225_vm13 = vcmp.ne.s32.totalorder %v221_v30, 0 }
 0x201   : > { %v957_v1 = vadd.f32 %v918_v22, %v803_v34  ;;  %v484_v21 = vadd.f32 %v3767_v25, %v3742_v7  ;;  %v3858_v17 = vsel %vm225_vm13, 1.0, %v4393_v58  ;;  %v806_v7 = vadd.f32 %v3797_v49, %v3789_v43 }
 0x202   : > { %v633_v16 = vadd.f32 %v3763_v23, %v478_v61  ;;  %v3853_v23 = vadd.f32 %v3769_v26, %v3746_v9  ;;  %v635_v39 = vadd.f32 %v3771_v27, %v481_v62  ;;  %v636_v45 = vadd.f32 %v3773_v28, %v510_v11 }
 0x203   : > { %v965_v25 = vmul.f32 %v3822_v54, %v957_v1  ;;  %v3866_v9 = vstv %s3824_s16  ;;  %v835_v22 = vadd.f32 %v3799_v50, %v3791_v44  ;;  %v966_v53 = vmul.f32 %v3858_v17, %v958_v40 }
 0x204   : > { %v1171_v5 = vpop.f32.mrf.mxu2  ;;  %v971_v3 = vadd.f32 %v963_v59, %v633_v16  ;;  %vm231_vm15 = vcmp.ne.s32.totalorder %v221_v30, 15  ;;  %v964_v37 = vmul.f32 %v3858_v17, %v956_v36  ;;  %v637_v50 = vadd.f32 %v3779_v33, %v484_v21  ;;  %v4395_v34 = vld [vmem:[#allocation9_spill] sm:$0xff] }
 0x205   : > { %v1200_v14 = vpop.f32.mrf.mxu3  ;;  %v1172_v60 = vadd.f32 %v1171_v5, %v1060_v56  ;;  %v3883_v30 = vsel %vm231_vm15, 1.0, %v4393_v58  ;;  %v953_v5 = vadd.f32 %v3793_v47, %v797_v46  ;;  %v4397_v47 = vld [vmem:[#allocation10_spill] sm:$0xff] }
 0x206   : > { %v3817_v10 = vpop.f32.mrf.mxu0  ;;  %v1201_v26 = vadd.f32 %v1200_v14, %v1089_v24  ;;  %v826_v14 = vadd.f32 %v3787_v38, %v3777_v31  ;;  %v959_v24 = vadd.f32 %v3805_v52, %v806_v7  ;;  %v974_v38 = vadd.f32 %v966_v53, %v636_v45  ;;  %v4398_v1 = vld [vmem:[#allocation11_spill] sm:$0xff] }
 0x207   : > { %v3819_v13 = vpop.f32.mrf.mxu1  ;;  %v972_v59 = vadd.f32 %v964_v37, %v634_v63 }
 0x208   : > { %v954_v31 = vadd.f32 %v3795_v48, %v826_v14  ;;  %v967_v58 = vmul.f32 %v3822_v54, %v959_v24 }
 0x20a   : > { %v962_v7 = vmul.f32 %v3858_v17, %v954_v31 }
 0x20c   : > { %v1174_v8 = vpop.f32.mrf.mxu2 }
 0x20d   : > { %v1203_v20 = vpop.f32.mrf.mxu3  ;;  %v1175_v27 = vadd.f32 %v1174_v8, %v1063_v15  ;;  %v960_v15 = vadd.f32 %v3807_v19, %v835_v22 }
 0x20e   : > { %v1287_v51 = vpop.f32.mrf.mxu0  ;;  %v1204_v55 = vadd.f32 %v1203_v20, %v1092_v57  ;;  %v973_v57 = vadd.f32 %v965_v25, %v635_v39  ;;  %v961_v39 = vmul.f32 %v3822_v54, %v953_v5 }
 0x20f   : > { %v1327_v56 = vadd.f32 %v1287_v51, %v1172_v60  ;;  %v1316_v18 = vpop.f32.mrf.mxu1  ;;  %v1169_v51 = vadd.f32 %v4395_v34, %v4394_v0  ;;  %v968_v16 = vmul.f32 %v3858_v17, %v960_v15 }
 0x210   : > { %v1328_v43 = vadd.f32 %v1316_v18, %v1201_v26  ;;  %v4401_v26 = vld [vmem:[#allocation4_spill] sm:$0xff] }
 0x211   : > { %v1335_v4 = vmul.f32 %v3844_v32, %v1327_v56  ;;  %v4396_v56 = vld [vmem:[#allocation8_spill] sm:$0xff]  ;;  %v1325_v6 = vadd.f32 %v3817_v10, %v1169_v51  ;;  %v4400_v10 = vld [vmem:[#allocation6_spill] sm:$0xff] }
 0x212   : > { %v1336_v33 = vmul.f32 %v3883_v30, %v1328_v43  ;;  %v1198_v18 = vadd.f32 %v4397_v47, %v4396_v56  ;;  %v638_v46 = vadd.f32 %v4400_v10, %v3853_v23 }
 0x213   : > { %v1343_v42 = vadd.f32 %v1335_v4, %v971_v3  ;;  %v4399_v3 = vld [vmem:[#allocation12_spill] sm:$0xff]  ;;  %v1333_v22 = vmul.f32 %v3844_v32, %v1325_v6 }
 0x214   : > { %v1177_v52 = vpop.f32.mrf.mxu2  ;;  %v1326_v12 = vadd.f32 %v3819_v13, %v1198_v18  ;;  %v1344_v40 = vadd.f32 %v1336_v33, %v972_v59  ;;  %v976_v23 = vadd.f32 %v968_v16, %v638_v46  ;;  %v2663_v46 = vld [vmem:[%s4379_s2 + $0x90] sm:$0xff] }
 0x215   : > { %vm1352_vm14 = vcmp.ge.f32.partialorder %v1343_v42, 0.0  ;;  %v1361_v28 = vmul.f32 %v3866_v9, %v1343_v42  ;;  %v1206_v62 = vpop.f32.mrf.mxu3  ;;  %v1178_v8 = vadd.f32 %v1177_v52, %v4398_v1 }
 0x216   : > { %v1290_v29 = vpop.f32.mrf.mxu0  ;;  %v1207_v20 = vadd.f32 %v1206_v62, %v4399_v3  ;;  %v1334_v37 = vmul.f32 %v3883_v30, %v1326_v12  ;;  %v1362_v14 = vmul.f32 %v3866_v9, %v1344_v40  ;;  %vm1353_vm12 = vcmp.ge.f32.partialorder %v1344_v40, 0.0 }
 0x217   : > { %v1329_v49 = vadd.f32 %v1290_v29, %v1175_v27  ;;  %v1319_v60 = vpop.f32.mrf.mxu1  ;;  %v3873_v61 = vsel %vm1352_vm14, %v1343_v42, %v1361_v28  ;;  %v631_v27 = vadd.f32 %v4401_v26, %v3830_v35  ;;  %v975_v28 = vadd.f32 %v967_v58, %v637_v50 }
 0x218   : > { %v1330_v44 = vadd.f32 %v1319_v60, %v1204_v55  ;;  %1387 = vrot.lane.b32.xlu0 %v3873_v61, %s3219_s22  ;;  %v4402_v55 = vld [vmem:[#allocation5_spill] sm:$0xff] }
 0x219   : > { %v1337_v2 = vmul.f32 %v3844_v32, %v1329_v49  ;;  %v632_v29 = vadd.f32 %v4402_v55, %v3834_v41  ;;  %v969_v49 = vadd.f32 %v961_v39, %v631_v27 }
 0x21a   : > { %v1338_v19 = vmul.f32 %v3883_v30, %v1330_v44 }
 0x21b   : > { %v1345_v11 = vadd.f32 %v1337_v2, %v973_v57  ;;  %v970_v35 = vadd.f32 %v962_v7, %v632_v29  ;;  %v1341_v15 = vadd.f32 %v1333_v22, %v969_v49  ;;  %v1370_v57 = vsel %vm1353_vm12, %v1344_v40, %v1362_v14 }
 0x21c   : > { %v1346_v48 = vadd.f32 %v1338_v19, %v974_v38 }
 0x21d   : > { %vm1354_vm1 = vcmp.ge.f32.partialorder %v1345_v11, 0.0  ;;  %v1363_v63 = vmul.f32 %v3866_v9, %v1345_v11  ;;  %v1342_v50 = vadd.f32 %v1334_v37, %v970_v35  ;;  %v1359_v31 = vmul.f32 %v3866_v9, %v1341_v15 }
 0x21e   : > { %v1293_v4 = vpop.f32.mrf.mxu0  ;;  %vm1355_vm11 = vcmp.ge.f32.partialorder %v1346_v48, 0.0  ;;  %v1364_v21 = vmul.f32 %v3866_v9, %v1346_v48  ;;  %vm1350_vm15 = vcmp.ge.f32.partialorder %v1341_v15, 0.0 }
 0x21f   : > { %v1331_v45 = vadd.f32 %v1293_v4, %v1178_v8  ;;  %v1322_v36 = vpop.f32.mrf.mxu1  ;;  %v1371_v42 = vsel %vm1354_vm1, %v1345_v11, %v1363_v63  ;;  %v1360_v38 = vmul.f32 %v3866_v9, %v1342_v50  ;;  %vm1351_vm1 = vcmp.ge.f32.partialorder %v1342_v50, 0.0 }
 0x220   : > { %v1332_v25 = vadd.f32 %v1322_v36, %v1207_v20  ;;  %1391 = vrot.lane.b32.xlu1 %v1371_v42, %s3219_s22  ;;  %v1372_v13 = vsel %vm1355_vm11, %v1346_v48, %v1364_v21  ;;  %v1367_v52 = vsel %vm1350_vm15, %v1341_v15, %v1359_v31 }
 0x221   : > { %v1339_v53 = vmul.f32 %v3844_v32, %v1331_v45  ;;  %1393 = vrot.lane.b32.xlu2 %v1372_v13, %s3219_s22  ;;  %v1368_v19 = vsel %vm1351_vm1, %v1342_v50, %v1360_v38  ;;  %v2661_v45 = vld [vmem:[%s4379_s2 + $0x80] sm:$0xff] }
 0x222   : > { %v1340_v43 = vmul.f32 %v3883_v30, %v1332_v25  ;;  %v2664_v25 = vld [vmem:[%s4379_s2 + $0x98] sm:$0xff] }
 0x223   : > { %v1347_v60 = vadd.f32 %v1339_v53, %v975_v28 }
 0x224   : > { %v1348_v24 = vadd.f32 %v1340_v43, %v976_v23 }
 0x225   : > { %vm1356_vm13 = vcmp.ge.f32.partialorder %v1347_v60, 0.0  ;;  %v1365_v44 = vmul.f32 %v3866_v9, %v1347_v60 }
 0x226   : > { %vm1357_vm14 = vcmp.ge.f32.partialorder %v1348_v24, 0.0  ;;  %v1366_v41 = vmul.f32 %v3866_v9, %v1348_v24 }
 0x227   : > { %v1373_v2 = vsel %vm1356_vm13, %v1347_v60, %v1365_v44 }
 0x228   : > { %1389 = vrot.lane.b32.xlu1 %v1370_v57, %s3219_s22  ;;  %1473 = vmatpush.msra.mxu2 %v1373_v2  ;;  %v1374_v5 = vsel %vm1357_vm14, %v1348_v24, %v1366_v41 }
 0x229   : > { %1502 = vmatpush.msra.mxu3 %v1374_v5  ;;  %1397 = vrot.lane.b32.xlu0 %v1374_v5, %s3219_s22 }
 0x22a   : > { %1395 = vrot.lane.b32.xlu2 %v1373_v2, %s3219_s22  ;;  %1474 = vmatpush.msra.mxu2 %v1371_v42  ;;  %v2662_v42 = vld [vmem:[%s4379_s2 + $0x88] sm:$0xff] }
 0x22b   : > { %1503 = vmatpush.msra.mxu3 %v1372_v13 }
 0x22c   : > { %1475 = vmatpush.msra.mxu2 %v3873_v61 }
 0x22d   : > { %1504 = vmatpush.msra.mxu3 %v1370_v57 }
 0x22e   : > { %1476 = vmatpush.msra.mxu2 %v1367_v52 }
 0x22f   : > { %1505 = vmatpush.msra.mxu3 %v1368_v19  ;;  %2665 = vmatmul.msk.f32.vlgmr.msra.gmra.mxu2 %vm321_vm3, %v2661_v45 }
 0x230   : > { %2669 = vmatmul.msk.f32.vlgmr.msra.gmra.mxu3 %vm321_vm3, %v2661_v45 }
 0x231   : > { %1385 = vrot.lane.b32.xlu0 %v1368_v19, %s3219_s22 }
 0x232   : > { %1383 = vrot.lane.b32.xlu2 %v1367_v52, %s3219_s22 }
 0x237   : > { %2666 = vmatmul.msk.f32.gmra.mxu2 %vm321_vm3, %v2662_v42 }
 0x238   : > { %2670 = vmatmul.msk.f32.gmra.mxu3 %vm321_vm3, %v2662_v42 }
 0x23f   : > { %2667 = vmatmul.msk.f32.gmra.mxu2 %vm321_vm3, %v2663_v46 }
 0x240   : > { %2671 = vmatmul.msk.f32.gmra.mxu3 %vm321_vm3, %v2663_v46 }
 0x247   : > { %2668 = vmatmul.msk.f32.gmra.mxu2 %vm321_vm3, %v2664_v25 }
 0x248   : > { %2672 = vmatmul.msk.f32.gmra.mxu3 %vm321_vm3, %v2664_v25 }
 0x27b   : > { %v1394_v59 = vpop.permute.xlu2 %1393 }
 0x27c   : > { %1423 = vst.msk [vmem:[#allocation2 + $0x40] sm:$0xff] %vm236_vm0, %v1394_v59 }
 0x283   : > { %v1435_v33 = vld [vmem:[#allocation2 + $0x40] sm:$0xff] }
 0x284   : > { %v1396_v0 = vpop.permute.xlu2 %1395 }
 0x285   : > { %1424 = vst.msk [vmem:[#allocation2 + $0x48] sm:$0xff] %vm286_vm2, %v1396_v0 }
 0x28a   : > { %v1388_v9 = vpop.permute.xlu0 %1387 }
 0x28b   : > { %1418 = vst.msk [vmem:[#allocation2 + $0x18] sm:$0xff] %vm286_vm2, %v1388_v9 }
 0x28c   : > { %v1384_v34 = vpop.permute.xlu2 %1383  ;;  %v3957_v3 = vld [vmem:[#allocation2 + $0x48] sm:$0xff] }
 0x28d   : > { %1415 = vst.msk [vmem:[#allocation2] sm:$0xff] %vm286_vm2, %v1384_v34 }
 0x292   : > { %v1392_v61 = vpop.permute.xlu1 %1391  ;;  %v3965_v39 = vld [vmem:[#allocation2 + $0x18] sm:$0xff] }
 0x293   : > { %v3932_v51 = vsel %vm236_vm0, %v1392_v61, %v1394_v59  ;;  %1421 = vst.msk [vmem:[#allocation2 + $0x30] sm:$0xff] %vm286_vm2, %v1392_v61 }
 0x294   : > { %v3012_v62 = vpack.i.bf16 %v1435_v33, %v3932_v51  ;;  %v3945_v47 = vld [vmem:[#allocation2] sm:$0xff] }
 0x296   : > { %3013 = vrot.lane.b32.xlu2 %v3012_v62, %s3220_s23 }
 0x29a   : > { %v1390_v11 = vpop.permute.xlu1 %1389  ;;  %v3953_v8 = vld [vmem:[#allocation2 + $0x30] sm:$0xff] }
 0x29b   : > { %v3938_v58 = vsel %vm236_vm0, %v1388_v9, %v1390_v11  ;;  %1420 = vst.msk [vmem:[#allocation2 + $0x28] sm:$0xff] %vm236_vm0, %v1390_v11  ;;  %v1398_v16 = vpop.permute.xlu0 %1397 }
 0x29c   : > { %v3942_v56 = vsel %vm236_vm0, %v1396_v0, %v1398_v16  ;;  %1426 = vst.msk [vmem:[#allocation2 + $0x58] sm:$0xff] %vm236_vm0, %v1398_v16  ;;  %v3002_v40 = vpack.i.bf16 %v3938_v58, %v3965_v39 }
 0x29d   : > { %v3027_v20 = vpack.i.bf16 %v3942_v56, %v3957_v3 }
 0x2a2   : > { %v1432_v18 = vld [vmem:[#allocation2 + $0x28] sm:$0xff] }
 0x2a3   : > { %v1386_v48 = vpop.permute.xlu0 %1385  ;;  %v2997_v6 = vpack.i.bf16 %v3945_v47, %v1432_v18  ;;  %v1438_v63 = vld [vmem:[#allocation2 + $0x58] sm:$0xff] }
 0x2a4   : > { %v3949_v1 = vsel %vm236_vm0, %v1384_v34, %v1386_v48  ;;  %1417 = vst.msk [vmem:[#allocation2 + $0x10] sm:$0xff] %vm236_vm0, %v1386_v48  ;;  %v3017_v12 = vpack.i.bf16 %v3953_v8, %v1438_v63 }
 0x2a5   : > { %2998 = vrot.lane.b32.xlu1 %v2997_v6, %s3221_s24 }
 0x2a6   : > { %3018 = vrot.lane.b32.xlu2 %v3017_v12, %s3221_s24 }
 0x2ab   : > { %v1429_v4 = vld [vmem:[#allocation2 + $0x10] sm:$0xff] }
 0x2ac   : > { %v2992_v21 = vpack.i.bf16 %v1429_v4, %v3949_v1 }
 0x2ad   : > { %3028 = vrot.lane.b32.xlu1 %v3027_v20, %s3221_s24 }
 0x2ae   : > { %2993 = vrot.lane.b32.xlu0 %v2992_v21, %s3221_s24  ;;  %3023 = vrot.lane.b32.xlu2 %v3017_v12, %s3220_s23 }
 0x2b5   : > { %3033 = vrot.lane.b32.xlu1 %v3027_v20, %s3220_s23 }
 0x2b6   : > { %3003 = vrot.lane.b32.xlu0 %v3002_v40, %s3221_s24  ;;  %3043 = vrot.lane.b32.xlu2 %v2997_v6, %s3220_s23 }
 0x2bd   : > { %3038 = vrot.lane.b32.xlu1 %v3002_v40, %s3220_s23 }
 0x2be   : > { %3008 = vrot.lane.b32.xlu0 %v3012_v62, %s3221_s24  ;;  %3053 = vrot.lane.b32.xlu2 %v3017_v12, %s3222_s25 }
 0x2c5   : > { %3063 = vrot.lane.b32.xlu1 %v3027_v20, %s3222_s25 }
 0x2c6   : > { %3048 = vrot.lane.b32.xlu0 %v2992_v21, %s3220_s23  ;;  %3073 = vrot.lane.b32.xlu2 %v2997_v6, %s3222_s25 }
 0x2cd   : > { %3068 = vrot.lane.b32.xlu1 %v3002_v40, %s3222_s25 }
 0x2ce   : > { %3058 = vrot.lane.b32.xlu0 %v3012_v62, %s3222_s25  ;;  %3083 = vrot.lane.b32.xlu2 %v3017_v12, %s3224_s27 }
 0x2d5   : > { %3103 = vrot.lane.b32.xlu1 %v2997_v6, %s3224_s27 }
 0x2d6   : > { %3078 = vrot.lane.b32.xlu0 %v2992_v21, %s3222_s25  ;;  %3093 = vrot.lane.b32.xlu2 %v3017_v12, %s3223_s26 }
 0x2dd   : > { %3118 = vrot.lane.b32.xlu1 %v3027_v20, %s3224_s27 }
 0x2de   : > { %3088 = vrot.lane.b32.xlu0 %v3012_v62, %s3224_s27  ;;  %3108 = vrot.lane.b32.xlu2 %v3012_v62, %s3223_s26 }
 0x2e5   : > { %3123 = vrot.lane.b32.xlu1 %v3027_v20, %s3223_s26 }
 0x2e6   : > { %3098 = vrot.lane.b32.xlu0 %v3002_v40, %s3224_s27  ;;  %3133 = vrot.lane.b32.xlu2 %v2997_v6, %s3223_s26 }
 0x2ed   : > { %3128 = vrot.lane.b32.xlu1 %v3002_v40, %s3223_s26 }
 0x2ee   : > { %3113 = vrot.lane.b32.xlu0 %v2992_v21, %s3224_s27  ;;  %3143 = vrot.lane.b32.xlu2 %v3017_v12, %s3226_s7  ;;  %s4328_s27 = scalar_lea.vmem %s4381_s4, %s2763_s3 }
 0x2f0   : > { %v3014_v36 = vpop.permute.xlu2 %3013 }
 0x2f1   : > { %v3016_v43 = vunpack.i.h.bf16 %v3014_v36  ;;  %v3015_v49 = vunpack.i.l.bf16 %v3014_v36 }
 0x2f3   : > { %v1560_v2 = vsel %vm428_vm4, %v3015_v49, %v3016_v43 }
 0x2f5   : > { %3163 = vrot.lane.b32.xlu1 %v2997_v6, %s3226_s7 }
 0x2f6   : > { %3138 = vrot.lane.b32.xlu0 %v2992_v21, %s3223_s26  ;;  %3153 = vrot.lane.b32.xlu2 %v3017_v12, %s3225_s30 }
 0x2fd   : > { %3178 = vrot.lane.b32.xlu1 %v3027_v20, %s3226_s7 }
 0x2fe   : > { %3148 = vrot.lane.b32.xlu0 %v3012_v62, %s3226_s7  ;;  %3168 = vrot.lane.b32.xlu2 %v3012_v62, %s3225_s30 }
 0x300   : > { %v3019_v10 = vpop.permute.xlu2 %3018 }
 0x301   : > { %v3020_v28 = vunpack.i.l.bf16 %v3019_v10  ;;  %v3021_v38 = vunpack.i.h.bf16 %v3019_v10 }
 0x305   : > { %3183 = vrot.lane.b32.xlu1 %v3027_v20, %s3225_s30 }
 0x306   : > { %3158 = vrot.lane.b32.xlu0 %v3002_v40, %s3226_s7  ;;  %3193 = vrot.lane.b32.xlu2 %v2997_v6, %s3225_s30 }
 0x308   : > { %v3024_v7 = vpop.permute.xlu2 %3023 }
 0x309   : > { %v3026_v14 = vunpack.i.h.bf16 %v3024_v7  ;;  %v3025_v35 = vunpack.i.l.bf16 %v3024_v7 }
 0x30b   : > { %v1559_v57 = vsel %vm428_vm4, %v3026_v14, %v3015_v49 }
 0x30d   : > { %3188 = vrot.lane.b32.xlu1 %v3002_v40, %s3225_s30 }
 0x30e   : > { %3173 = vrot.lane.b32.xlu0 %v2992_v21, %s3226_s7 }
 0x310   : > { %v4025_v26 = vpop.permute.xlu2 %3043 }
 0x311   : > { %v3045_v52 = vunpack.i.l.bf16 %v4025_v26  ;;  %v3046_v46 = vunpack.i.h.bf16 %v4025_v26  ;;  %v2657_v26 = vld [vmem:[%s4379_s2 + $0x20] sm:$0xff] }
 0x316   : > { %3198 = vrot.lane.b32.xlu0 %v2992_v21, %s3225_s30  ;;  %v2681_v21 = vld [vmem:[%s4379_s2 + $0xe0] sm:$0xff] }
 0x317   : > { %v2999_v13 = vpop.permute.xlu1 %2998 }
 0x318   : > { %v4029_v37 = vpop.permute.xlu2 %3053  ;;  %v3000_v62 = vunpack.i.l.bf16 %v2999_v13  ;;  %v3001_v12 = vunpack.i.h.bf16 %v2999_v13 }
 0x31f   : > { %v3029_v27 = vpop.permute.xlu1 %3028 }
 0x320   : > { %v3031_v22 = vunpack.i.h.bf16 %v3029_v27  ;;  %v3030_v53 = vunpack.i.l.bf16 %v3029_v27  ;;  %v2994_v55 = vpop.permute.xlu0 %2993  ;;  %v4035_v5 = vpop.permute.xlu2 %3073 }
 0x321   : > { %v2996_v18 = vunpack.i.h.bf16 %v2994_v55  ;;  %v2995_v48 = vunpack.i.l.bf16 %v2994_v55  ;;  %v2682_v55 = vld [vmem:[%s4379_s2 + $0xe8] sm:$0xff] }
 0x322   : > { %v1676_v29 = vsel %vm544_vm5, %v3030_v53, %v3031_v22  ;;  %v1677_v23 = vsel %vm544_vm5, %v3031_v22, %v3020_v28  ;;  %v3055_v53 = vunpack.i.l.bf16 %v4029_v37 }
 0x323   : > { %1710 = vmatpush.msrb.mxu2 %v1676_v29  ;;  %1739 = vmatpush.msrb.mxu3 %v1677_v23  ;;  %v1670_v36 = vsel %vm544_vm5, %v3001_v12, %v2995_v48  ;;  %v1671_v42 = vsel %vm544_vm5, %v2995_v48, %v2996_v18  ;;  %v1772_v12 = vld [vmem:[%s4379_s2] sm:$0xff] }
 0x327   : > { %v3034_v60 = vpop.permute.xlu1 %3033 }
 0x328   : > { %v3036_v24 = vunpack.i.h.bf16 %v3034_v60  ;;  %v3035_v15 = vunpack.i.l.bf16 %v3034_v60  ;;  %v3004_v44 = vpop.permute.xlu0 %3003  ;;  %v4047_v40 = vpop.permute.xlu2 %3083 }
 0x329   : > { %v3006_v9 = vunpack.i.h.bf16 %v3004_v44  ;;  %v3005_v34 = vunpack.i.l.bf16 %v3004_v44 }
 0x32a   : > { %v1561_v50 = vsel %vm428_vm4, %v3035_v15, %v3036_v24  ;;  %v1562_v41 = vsel %vm428_vm4, %v3036_v24, %v3025_v35  ;;  %v3075_v35 = vunpack.i.l.bf16 %v4035_v5  ;;  %v2683_v24 = vld [vmem:[%s4379_s2 + $0xf0] sm:$0xff] }
 0x32b   : > { %1595 = vmatpush.msrb.mxu0 %v1561_v50  ;;  %1624 = vmatpush.msrb.mxu1 %v1562_v41  ;;  %v1672_v20 = vsel %vm544_vm5, %v3005_v34, %v3006_v9  ;;  %v1673_v4 = vsel %vm544_vm5, %v3006_v9, %v3000_v62  ;;  %v3076_v50 = vunpack.i.h.bf16 %v4035_v5  ;;  %v2684_v5 = vld [vmem:[%s4379_s2 + $0xf8] sm:$0xff] }
 0x32d   : > { %1596 = vmatpush.msrb.mxu0 %v1559_v57  ;;  %1625 = vmatpush.msrb.mxu1 %v1560_v2 }
 0x32f   : > { %v3039_v31 = vpop.permute.xlu1 %3038 }
 0x330   : > { %v3041_v19 = vunpack.i.h.bf16 %v3039_v31  ;;  %v3040_v59 = vunpack.i.l.bf16 %v3039_v31  ;;  %v3009_v0 = vpop.permute.xlu0 %3008  ;;  %v4074_v23 = vpop.permute.xlu2 %3093 }
 0x331   : > { %v3011_v61 = vunpack.i.h.bf16 %v3009_v0  ;;  %v3010_v33 = vunpack.i.l.bf16 %v3009_v0 }
 0x332   : > { %v1557_v11 = vsel %vm428_vm4, %v3040_v59, %v3041_v19  ;;  %v1558_v16 = vsel %vm428_vm4, %v3041_v19, %v3045_v52  ;;  %v2659_v52 = vld [vmem:[%s4379_s2 + $0x30] sm:$0xff]  ;;  %v3085_v59 = vunpack.i.l.bf16 %v4047_v40 }
 0x333   : > { %1597 = vmatpush.msrb.mxu0 %v1557_v11  ;;  %1626 = vmatpush.msrb.mxu1 %v1558_v16  ;;  %v1674_v6 = vsel %vm544_vm5, %v3021_v38, %v3010_v33  ;;  %v1675_v63 = vsel %vm544_vm5, %v3010_v33, %v3011_v61  ;;  %v3086_v61 = vunpack.i.h.bf16 %v4047_v40 }
 0x334   : > { %1711 = vmatpush.msrb.mxu2 %v1674_v6  ;;  %1740 = vmatpush.msrb.mxu3 %v1675_v63  ;;  %v2660_v6 = vld [vmem:[%s4379_s2 + $0x38] sm:$0xff] }
 0x336   : > { %1712 = vmatpush.msrb.mxu2 %v1672_v20  ;;  %1741 = vmatpush.msrb.mxu3 %v1673_v4  ;;  %v3095_v20 = vunpack.i.l.bf16 %v4074_v23 }
 0x337   : > { %v3064_v45 = vpop.permute.xlu1 %3063 }
 0x338   : > { %v3049_v10 = vpop.permute.xlu0 %3048  ;;  %1713 = vmatpush.msrb.mxu2 %v1670_v36  ;;  %1742 = vmatpush.msrb.mxu3 %v1671_v42  ;;  %v3066_v13 = vunpack.i.h.bf16 %v3064_v45  ;;  %v3065_v27 = vunpack.i.l.bf16 %v3064_v45  ;;  %v3109_v2 = vpop.permute.xlu2 %3108 }
 0x339   : > { %v3051_v7 = vunpack.i.h.bf16 %v3049_v10  ;;  %v3050_v25 = vunpack.i.l.bf16 %v3049_v10  ;;  %2685 = vmatmul.msk.f32.vlgmr.msrb.gmra.mxu2 %vm321_vm3, %v2681_v21  ;;  %2689 = vmatmul.msk.f32.vlgmr.msrb.gmra.mxu3 %vm321_vm3, %v2681_v21  ;;  %v3111_v21 = vunpack.i.h.bf16 %v3109_v2  ;;  %v3110_v40 = vunpack.i.l.bf16 %v3109_v2 }
 0x33a   : > { %1915 = vmatpush.msra.mxu2 %v3957_v3  ;;  %1944 = vmatpush.msra.mxu3 %v3942_v56  ;;  %v1811_v56 = vsel %vm680_vm6, %v3065_v27, %v3066_v13  ;;  %v1812_v3 = vsel %vm680_vm6, %v3066_v13, %v3055_v53 }
 0x33b   : > { %v1555_v28 = vsel %vm428_vm4, %v3046_v46, %v3050_v25  ;;  %v1556_v22 = vsel %vm428_vm4, %v3050_v25, %v3051_v7  ;;  %v3096_v25 = vunpack.i.h.bf16 %v4074_v23 }
 0x33c   : > { %1916 = vmatpush.msra.mxu2 %v3953_v8  ;;  %1945 = vmatpush.msra.mxu3 %v3932_v51  ;;  %v3056_v8 = vunpack.i.h.bf16 %v4029_v37  ;;  %v2658_v37 = vld [vmem:[%s4379_s2 + $0x28] sm:$0xff] }
 0x33d   : > { %1598 = vmatpush.msrb.mxu0 %v1555_v28  ;;  %1627 = vmatpush.msrb.mxu1 %v1556_v22  ;;  %v1994_v53 = vsel %vm866_vm8, %v3096_v25, %v3110_v40 }
 0x33e   : > { %2673 = vmatmul.msk.f32.vlgmr.msrb.gmra.mxu0 %vm321_vm3, %v2657_v26  ;;  %2677 = vmatmul.msk.f32.vlgmr.msrb.gmra.mxu1 %vm321_vm3, %v2657_v26  ;;  %v2693_v26 = vld [vmem:[%s4379_s2 + $0x60] sm:$0xff] }
 0x33f   : > { %1845 = vmatpush.msra.mxu0 %v1811_v56  ;;  %1874 = vmatpush.msra.mxu1 %v1812_v3  ;;  %v3069_v29 = vpop.permute.xlu1 %3068  ;;  %v1995_v56 = vsel %vm866_vm8, %v3110_v40, %v3111_v21  ;;  %v1773_v3 = vld [vmem:[%s4379_s2 + $0x8] sm:$0xff] }
 0x340   : > { %1917 = vmatpush.msra.mxu2 %v3965_v39  ;;  %1946 = vmatpush.msra.mxu3 %v3938_v58  ;;  %v3059_v51 = vpop.permute.xlu0 %3058  ;;  %v3071_v60 = vunpack.i.h.bf16 %v3069_v29  ;;  %v3070_v14 = vunpack.i.l.bf16 %v3069_v29  ;;  %v4119_v63 = vpop.permute.xlu2 %3133 }
 0x341   : > { %v3061_v43 = vunpack.i.h.bf16 %v3059_v51  ;;  %v3060_v49 = vunpack.i.l.bf16 %v3059_v51  ;;  %2686 = vmatmul.msk.f32.gmra.mxu2 %vm321_vm3, %v2682_v55  ;;  %2690 = vmatmul.msk.f32.gmra.mxu3 %vm321_vm3, %v2682_v55  ;;  %v3135_v51 = vunpack.i.l.bf16 %v4119_v63 }
 0x342   : > { %1918 = vmatpush.msra.mxu2 %v3945_v47  ;;  %1947 = vmatpush.msra.mxu3 %v3949_v1  ;;  %v1807_v47 = vsel %vm680_vm6, %v3070_v14, %v3071_v60  ;;  %v1808_v1 = vsel %vm680_vm6, %v3071_v60, %v3075_v35 }
 0x343   : > { %v1809_v39 = vsel %vm680_vm6, %v3056_v8, %v3060_v49  ;;  %v1810_v58 = vsel %vm680_vm6, %v3060_v49, %v3061_v43 }
 0x344   : > { %1846 = vmatpush.msra.mxu0 %v1809_v39  ;;  %1875 = vmatpush.msra.mxu1 %v1810_v58 }
 0x346   : > { %2674 = vmatmul.msk.f32.gmra.mxu0 %vm321_vm3, %v2658_v37  ;;  %2678 = vmatmul.msk.f32.gmra.mxu1 %vm321_vm3, %v2658_v37 }
 0x347   : > { %v4093_v15 = vpop.permute.xlu1 %3103  ;;  %1847 = vmatpush.msra.mxu0 %v1807_v47  ;;  %1876 = vmatpush.msra.mxu1 %v1808_v1  ;;  %v2694_v47 = vld [vmem:[%s4379_s2 + $0x68] sm:$0xff]  ;;  %v1774_v1 = vld [vmem:[%s4379_s2 + $0x10] sm:$0xff] }
 0x348   : > { %v3079_v44 = vpop.permute.xlu0 %3078  ;;  %v3105_v10 = vunpack.i.l.bf16 %v4093_v15  ;;  %v3144_v55 = vpop.permute.xlu2 %3143  ;;  %v3106_v49 = vunpack.i.h.bf16 %v4093_v15 }
 0x349   : > { %v3081_v41 = vunpack.i.h.bf16 %v3079_v44  ;;  %v3080_v57 = vunpack.i.l.bf16 %v3079_v44  ;;  %2687 = vmatmul.msk.f32.gmra.mxu2 %vm321_vm3, %v2683_v24  ;;  %2691 = vmatmul.msk.f32.gmra.mxu3 %vm321_vm3, %v2683_v24  ;;  %v3136_v44 = vunpack.i.h.bf16 %v4119_v63  ;;  %v2729_v63 = vld [vmem:[%s4379_s2 + $0xa0] sm:$0xff] }
 0x34b   : > { %v1805_v31 = vsel %vm680_vm6, %v3076_v50, %v3080_v57  ;;  %v1806_v38 = vsel %vm680_vm6, %v3080_v57, %v3081_v41 }
 0x34c   : > { %1848 = vmatpush.msra.mxu0 %v1805_v31  ;;  %1877 = vmatpush.msra.mxu1 %v1806_v38  ;;  %v2695_v38 = vld [vmem:[%s4379_s2 + $0x70] sm:$0xff] }
 0x34e   : > { %2675 = vmatmul.msk.f32.gmra.mxu0 %vm321_vm3, %v2659_v52  ;;  %2679 = vmatmul.msk.f32.gmra.mxu1 %vm321_vm3, %v2659_v52  ;;  %v1775_v52 = vld [vmem:[%s4379_s2 + $0x18] sm:$0xff] }
 0x34f   : > { %v3119_v19 = vpop.permute.xlu1 %3118 }
 0x350   : > { %v3121_v0 = vunpack.i.h.bf16 %v3119_v19  ;;  %v3120_v9 = vunpack.i.l.bf16 %v3119_v19  ;;  %v3089_v34 = vpop.permute.xlu0 %3088  ;;  %v3154_v50 = vpop.permute.xlu2 %3153  ;;  %v3145_v19 = vunpack.i.l.bf16 %v3144_v55 }
 0x351   : > { %v3091_v33 = vunpack.i.h.bf16 %v3089_v34  ;;  %v3090_v62 = vunpack.i.l.bf16 %v3089_v34  ;;  %2688 = vmatmul.msk.f32.gmra.mxu2 %vm321_vm3, %v2684_v5  ;;  %2692 = vmatmul.msk.f32.gmra.mxu3 %vm321_vm3, %v2684_v5  ;;  %v3146_v34 = vunpack.i.h.bf16 %v3144_v55 }
 0x352   : > { %v2140_v11 = vsel %vm1011_vm7, %v3120_v9, %v3121_v0  ;;  %v2141_v16 = vsel %vm1011_vm7, %v3121_v0, %v3085_v59 }
 0x353   : > { %2174 = vmatpush.msrb.mxu2 %v2140_v11  ;;  %2203 = vmatpush.msrb.mxu3 %v2141_v16  ;;  %v2138_v18 = vsel %vm1011_vm7, %v3086_v61, %v3090_v62  ;;  %v2139_v48 = vsel %vm1011_vm7, %v3090_v62, %v3091_v33 }
 0x355   : > { %2175 = vmatpush.msrb.mxu2 %v2138_v18  ;;  %2204 = vmatpush.msrb.mxu3 %v2139_v48 }
 0x356   : > { %2676 = vmatmul.msk.f32.gmra.mxu0 %vm321_vm3, %v2660_v6  ;;  %2680 = vmatmul.msk.f32.gmra.mxu1 %vm321_vm3, %v2660_v6  ;;  %v2696_v6 = vld [vmem:[%s4379_s2 + $0x78] sm:$0xff] }
 0x357   : > { %v3124_v4 = vpop.permute.xlu1 %3123 }
 0x358   : > { %v3126_v45 = vunpack.i.h.bf16 %v3124_v4  ;;  %v3125_v36 = vunpack.i.l.bf16 %v3124_v4  ;;  %v3099_v42 = vpop.permute.xlu0 %3098  ;;  %v3169_v16 = vpop.permute.xlu2 %3168 }
 0x359   : > { %v3101_v46 = vunpack.i.h.bf16 %v3099_v42  ;;  %v3100_v7 = vunpack.i.l.bf16 %v3099_v42  ;;  %2705 = vmatmul.msk.f32.vlgmr.msra.gmra.mxu2 %vm321_vm3, %v1772_v12  ;;  %2709 = vmatmul.msk.f32.vlgmr.msra.gmra.mxu3 %vm321_vm3, %v1772_v12  ;;  %v3155_v12 = vunpack.i.l.bf16 %v3154_v50  ;;  %v3171_v4 = vunpack.i.h.bf16 %v3169_v16 }
 0x35a   : > { %v1996_v13 = vsel %vm866_vm8, %v3125_v36, %v3126_v45  ;;  %v1997_v27 = vsel %vm866_vm8, %v3126_v45, %v3095_v20  ;;  %v3170_v21 = vunpack.i.l.bf16 %v3169_v16  ;;  %v2752_v16 = vld [vmem:[%s4379_s2 + $0x118] sm:$0xff] }
 0x35b   : > { %2030 = vmatpush.msrb.mxu0 %v1996_v13  ;;  %2059 = vmatpush.msrb.mxu1 %v1997_v27  ;;  %v2136_v28 = vsel %vm1011_vm7, %v3100_v7, %v3101_v46  ;;  %v2137_v22 = vsel %vm1011_vm7, %v3101_v46, %v3105_v10  ;;  %v3156_v7 = vunpack.i.h.bf16 %v3154_v50 }
 0x35c   : > { %2176 = vmatpush.msrb.mxu2 %v2136_v28  ;;  %2205 = vmatpush.msrb.mxu3 %v2137_v22  ;;  %v2713_v22 = vld [vmem:[%s4379_s2 + $0xc0] sm:$0xff] }
 0x35d   : > { %2031 = vmatpush.msrb.mxu0 %v1994_v53  ;;  %2060 = vmatpush.msrb.mxu1 %v1995_v56  ;;  %v2249_v53 = vsel %vm1122_vm9, %v3170_v21, %v3171_v4 }
 0x35e   : > { %2697 = vmatmul.msk.f32.vlgmr.msra.gmra.mxu0 %vm321_vm3, %v2693_v26  ;;  %2701 = vmatmul.msk.f32.vlgmr.msra.gmra.mxu1 %vm321_vm3, %v2693_v26  ;;  %v2248_v26 = vsel %vm1122_vm9, %v3156_v7, %v3170_v21 }
 0x35f   : > { %v3129_v29 = vpop.permute.xlu1 %3128 }
 0x360   : > { %v3131_v8 = vunpack.i.h.bf16 %v3129_v29  ;;  %v3130_v23 = vunpack.i.l.bf16 %v3129_v29  ;;  %v3114_v43 = vpop.permute.xlu0 %3113  ;;  %v3194_v56 = vpop.permute.xlu2 %3193 }
 0x361   : > { %v3116_v60 = vunpack.i.h.bf16 %v3114_v43  ;;  %v3115_v14 = vunpack.i.l.bf16 %v3114_v43  ;;  %2706 = vmatmul.msk.f32.gmra.mxu2 %vm321_vm3, %v1773_v3  ;;  %2710 = vmatmul.msk.f32.gmra.mxu3 %vm321_vm3, %v1773_v3  ;;  %v2730_v3 = vld [vmem:[%s4379_s2 + $0xa8] sm:$0xff]  ;;  %v3195_v29 = vunpack.i.l.bf16 %v3194_v56 }
 0x362   : > { %v1992_v39 = vsel %vm866_vm8, %v3130_v23, %v3131_v8  ;;  %v1993_v58 = vsel %vm866_vm8, %v3131_v8, %v3135_v51 }
 0x363   : > { %2032 = vmatpush.msrb.mxu0 %v1992_v39  ;;  %2061 = vmatpush.msrb.mxu1 %v1993_v58  ;;  %v2134_v37 = vsel %vm1011_vm7, %v3106_v49, %v3115_v14  ;;  %v2135_v35 = vsel %vm1011_vm7, %v3115_v14, %v3116_v60 }
 0x364   : > { %2177 = vmatpush.msrb.mxu2 %v2134_v37  ;;  %2206 = vmatpush.msrb.mxu3 %v2135_v35  ;;  %v2714_v35 = vld [vmem:[%s4379_s2 + $0xc8] sm:$0xff] }
 0x366   : > { %2698 = vmatmul.msk.f32.gmra.mxu0 %vm321_vm3, %v2694_v47  ;;  %2702 = vmatmul.msk.f32.gmra.mxu1 %vm321_vm3, %v2694_v47  ;;  %v2731_v47 = vld [vmem:[%s4379_s2 + $0xb0] sm:$0xff] }
 0x367   : > { %v4161_v24 = vpop.permute.xlu1 %3163 }
 0x368   : > { %v3139_v15 = vpop.permute.xlu0 %3138  ;;  %v3165_v42 = vunpack.i.l.bf16 %v4161_v24  ;;  %v3166_v43 = vunpack.i.h.bf16 %v4161_v24  ;;  %v3196_v24 = vunpack.i.h.bf16 %v3194_v56 }
 0x369   : > { %v3141_v41 = vunpack.i.h.bf16 %v3139_v15  ;;  %v3140_v57 = vunpack.i.l.bf16 %v3139_v15  ;;  %2707 = vmatmul.msk.f32.gmra.mxu2 %vm321_vm3, %v1774_v1  ;;  %2711 = vmatmul.msk.f32.gmra.mxu3 %vm321_vm3, %v1774_v1 }
 0x36b   : > { %v1990_v2 = vsel %vm866_vm8, %v3136_v44, %v3140_v57  ;;  %v1991_v31 = vsel %vm866_vm8, %v3140_v57, %v3141_v41  ;;  %v2715_v57 = vld [vmem:[%s4379_s2 + $0xd0] sm:$0xff] }
 0x36c   : > { %2033 = vmatpush.msrb.mxu0 %v1990_v2  ;;  %2062 = vmatpush.msrb.mxu1 %v1991_v31  ;;  %v2732_v2 = vld [vmem:[%s4379_s2 + $0xb8] sm:$0xff] }
 0x36d   : > { %v2716_v31 = vld [vmem:[%s4379_s2 + $0xd8] sm:$0xff] }
 0x36e   : > { %2699 = vmatmul.msk.f32.gmra.mxu0 %vm321_vm3, %v2695_v38  ;;  %2703 = vmatmul.msk.f32.gmra.mxu1 %vm321_vm3, %v2695_v38  ;;  %v1478_v38 = vpop.f32.mrf.mxu2 }
 0x36f   : > { %v3179_v5 = vpop.permute.xlu1 %3178 }
 0x370   : > { %v3181_v59 = vunpack.i.h.bf16 %v3179_v5  ;;  %v3180_v0 = vunpack.i.l.bf16 %v3179_v5  ;;  %v3149_v9 = vpop.permute.xlu0 %3148  ;;  %v2749_v5 = vld [vmem:[%s4379_s2 + $0x100] sm:$0xff] }
 0x371   : > { %v3151_v61 = vunpack.i.h.bf16 %v3149_v9  ;;  %v3150_v33 = vunpack.i.l.bf16 %v3149_v9  ;;  %2708 = vmatmul.msk.f32.gmra.mxu2 %vm321_vm3, %v1775_v52  ;;  %2712 = vmatmul.msk.f32.gmra.mxu3 %vm321_vm3, %v1775_v52  ;;  %v1507_v52 = vpop.f32.mrf.mxu3 }
 0x372   : > { %v2365_v62 = vsel %vm1238_vm10, %v3180_v0, %v3181_v59  ;;  %v2366_v11 = vsel %vm1238_vm10, %v3181_v59, %v3145_v19  ;;  %v2725_v19 = vld [vmem:[%s4379_s2 + $0x40] sm:$0xff]  ;;  %v2750_v59 = vld [vmem:[%s4379_s2 + $0x108] sm:$0xff] }
 0x373   : > { %2399 = vmatpush.msra.mxu2 %v2365_v62  ;;  %2428 = vmatpush.msra.mxu3 %v2366_v11  ;;  %v2363_v18 = vsel %vm1238_vm10, %v3146_v34, %v3150_v33  ;;  %v2364_v48 = vsel %vm1238_vm10, %v3150_v33, %v3151_v61  ;;  %v2726_v34 = vld [vmem:[%s4379_s2 + $0x48] sm:$0xff]  ;;  %v2751_v61 = vld [vmem:[%s4379_s2 + $0x110] sm:$0xff] }
 0x374   : > { %v2727_v11 = vld [vmem:[%s4379_s2 + $0x50] sm:$0xff] }
 0x375   : > { %2400 = vmatpush.msra.mxu2 %v2363_v18  ;;  %2429 = vmatpush.msra.mxu3 %v2364_v48 }
 0x376   : > { %2700 = vmatmul.msk.f32.gmra.mxu0 %vm321_vm3, %v2696_v6  ;;  %2704 = vmatmul.msk.f32.gmra.mxu1 %vm321_vm3, %v2696_v6  ;;  %v1481_v0 = vpop.f32.mrf.mxu2  ;;  %v2728_v6 = vld [vmem:[%s4379_s2 + $0x58] sm:$0xff] }
 0x377   : > { %v3184_v20 = vpop.permute.xlu1 %3183 }
 0x378   : > { %v3186_v40 = vunpack.i.h.bf16 %v3184_v20  ;;  %v3185_v45 = vunpack.i.l.bf16 %v3184_v20  ;;  %v3159_v36 = vpop.permute.xlu0 %3158 }
 0x379   : > { %v3161_v10 = vunpack.i.h.bf16 %v3159_v36  ;;  %v3160_v46 = vunpack.i.l.bf16 %v3159_v36  ;;  %2733 = vmatmul.msk.f32.vlgmr.msrb.gmra.mxu2 %vm321_vm3, %v2729_v63  ;;  %2737 = vmatmul.msk.f32.vlgmr.msrb.gmra.mxu3 %vm321_vm3, %v2729_v63  ;;  %v1510_v9 = vpop.f32.mrf.mxu3 }
 0x37a   : > { %v2250_v25 = vsel %vm1122_vm9, %v3185_v45, %v3186_v40  ;;  %v2251_v13 = vsel %vm1122_vm9, %v3186_v40, %v3155_v12 }
 0x37b   : > { %2284 = vmatpush.msra.mxu0 %v2250_v25  ;;  %2313 = vmatpush.msra.mxu1 %v2251_v13  ;;  %v2361_v27 = vsel %vm1238_vm10, %v3160_v46, %v3161_v10  ;;  %v2362_v28 = vsel %vm1238_vm10, %v3161_v10, %v3165_v42 }
 0x37c   : > { %2401 = vmatpush.msra.mxu2 %v2361_v27  ;;  %2430 = vmatpush.msra.mxu3 %v2362_v28 }
 0x37d   : > { %2285 = vmatpush.msra.mxu0 %v2248_v26  ;;  %2314 = vmatpush.msra.mxu1 %v2249_v53 }
 0x37e   : > { %2717 = vmatmul.msk.f32.vlgmr.msrb.gmra.mxu0 %vm321_vm3, %v2713_v22  ;;  %2721 = vmatmul.msk.f32.vlgmr.msrb.gmra.mxu1 %vm321_vm3, %v2713_v22  ;;  %v1484_v33 = vpop.f32.mrf.mxu2 }
 0x37f   : > { %v3189_v55 = vpop.permute.xlu1 %3188 }
 0x380   : > { %v3191_v51 = vunpack.i.h.bf16 %v3189_v55  ;;  %v3190_v8 = vunpack.i.l.bf16 %v3189_v55  ;;  %v3174_v23 = vpop.permute.xlu0 %3173 }
 0x381   : > { %v3176_v49 = vunpack.i.h.bf16 %v3174_v23  ;;  %v3175_v60 = vunpack.i.l.bf16 %v3174_v23  ;;  %2734 = vmatmul.msk.f32.gmra.mxu2 %vm321_vm3, %v2730_v3  ;;  %2738 = vmatmul.msk.f32.gmra.mxu3 %vm321_vm3, %v2730_v3  ;;  %v1513_v62 = vpop.f32.mrf.mxu3 }
 0x382   : > { %v2246_v14 = vsel %vm1122_vm9, %v3190_v8, %v3191_v51  ;;  %v2247_v39 = vsel %vm1122_vm9, %v3191_v51, %v3195_v29 }
 0x383   : > { %2286 = vmatpush.msra.mxu0 %v2246_v14  ;;  %2315 = vmatpush.msra.mxu1 %v2247_v39  ;;  %v2359_v58 = vsel %vm1238_vm10, %v3166_v43, %v3175_v60  ;;  %v2360_v37 = vsel %vm1238_vm10, %v3175_v60, %v3176_v49 }
 0x384   : > { %2402 = vmatpush.msra.mxu2 %v2359_v58  ;;  %2431 = vmatpush.msra.mxu3 %v2360_v37 }
 0x386   : > { %2718 = vmatmul.msk.f32.gmra.mxu0 %vm321_vm3, %v2714_v35  ;;  %2722 = vmatmul.msk.f32.gmra.mxu1 %vm321_vm3, %v2714_v35  ;;  %v1487_v18 = vpop.f32.mrf.mxu2 }
 0x388   : > { %v3199_v1 = vpop.permute.xlu0 %3198 }
 0x389   : > { %v3201_v15 = vunpack.i.h.bf16 %v3199_v1  ;;  %v3200_v44 = vunpack.i.l.bf16 %v3199_v1  ;;  %2735 = vmatmul.msk.f32.gmra.mxu2 %vm321_vm3, %v2731_v47  ;;  %2739 = vmatmul.msk.f32.gmra.mxu3 %vm321_vm3, %v2731_v47  ;;  %v1516_v48 = vpop.f32.mrf.mxu3 }
 0x38b   : > { %v2244_v50 = vsel %vm1122_vm9, %v3196_v24, %v3200_v44  ;;  %v2245_v41 = vsel %vm1122_vm9, %v3200_v44, %v3201_v15 }
 0x38c   : > { %2287 = vmatpush.msra.mxu0 %v2244_v50  ;;  %2316 = vmatpush.msra.mxu1 %v2245_v41 }
 0x38e   : > { %2719 = vmatmul.msk.f32.gmra.mxu0 %vm321_vm3, %v2715_v57  ;;  %2723 = vmatmul.msk.f32.gmra.mxu1 %vm321_vm3, %v2715_v57 }
 0x391   : > { %2736 = vmatmul.msk.f32.gmra.mxu2 %vm321_vm3, %v2732_v2  ;;  %2740 = vmatmul.msk.f32.gmra.mxu3 %vm321_vm3, %v2732_v2 }
 0x396   : > { %2720 = vmatmul.msk.f32.gmra.mxu0 %vm321_vm3, %v2716_v31  ;;  %2724 = vmatmul.msk.f32.gmra.mxu1 %vm321_vm3, %v2716_v31 }
 0x399   : > { %2753 = vmatmul.msk.f32.vlgmr.msra.gmra.mxu2 %vm321_vm3, %v2749_v5  ;;  %2757 = vmatmul.msk.f32.vlgmr.msra.gmra.mxu3 %vm321_vm3, %v2749_v5 }
 0x39e   : > { %2741 = vmatmul.msk.f32.vlgmr.msra.gmra.mxu0 %vm321_vm3, %v2725_v19  ;;  %2745 = vmatmul.msk.f32.vlgmr.msra.gmra.mxu1 %vm321_vm3, %v2725_v19 }
 0x3a1   : > { %2754 = vmatmul.msk.f32.gmra.mxu2 %vm321_vm3, %v2750_v59  ;;  %2758 = vmatmul.msk.f32.gmra.mxu3 %vm321_vm3, %v2750_v59 }
 0x3a6   : > { %2742 = vmatmul.msk.f32.gmra.mxu0 %vm321_vm3, %v2726_v34  ;;  %2746 = vmatmul.msk.f32.gmra.mxu1 %vm321_vm3, %v2726_v34 }
 0x3a9   : > { %2755 = vmatmul.msk.f32.gmra.mxu2 %vm321_vm3, %v2751_v61  ;;  %2759 = vmatmul.msk.f32.gmra.mxu3 %vm321_vm3, %v2751_v61 }
 0x3ae   : > { %2743 = vmatmul.msk.f32.gmra.mxu0 %vm321_vm3, %v2727_v11  ;;  %2747 = vmatmul.msk.f32.gmra.mxu1 %vm321_vm3, %v2727_v11 }
 0x3b1   : > { %2756 = vmatmul.msk.f32.gmra.mxu2 %vm321_vm3, %v2752_v16  ;;  %2760 = vmatmul.msk.f32.gmra.mxu3 %vm321_vm3, %v2752_v16 }
 0x3b6   : > { %2744 = vmatmul.msk.f32.gmra.mxu0 %vm321_vm3, %v2728_v6  ;;  %2748 = vmatmul.msk.f32.gmra.mxu1 %vm321_vm3, %v2728_v6 }
 0x3bb   : > { %v1600_v63 = vpop.f32.mrf.mxu0  ;;  %v1629_v12 = vpop.f32.mrf.mxu1 }
 0x3bc   : > { %v1601_v20 = vadd.f32 %v1600_v63, %v1478_v38  ;;  %v1630_v4 = vadd.f32 %v1629_v12, %v1507_v52  ;;  %v1715_v21 = vpop.f32.mrf.mxu2  ;;  %v1744_v40 = vpop.f32.mrf.mxu3 }
 0x3be   : > { %v4281_v45 = vadd.f32 %v1715_v21, %v1601_v20  ;;  %v4283_v36 = vadd.f32 %v1744_v40, %v1630_v4 }
 0x3c3   : > { %v1603_v42 = vpop.f32.mrf.mxu0  ;;  %v1632_v10 = vpop.f32.mrf.mxu1 }
 0x3c4   : > { %v1604_v46 = vadd.f32 %v1603_v42, %v1481_v0  ;;  %v1633_v7 = vadd.f32 %v1632_v10, %v1510_v9  ;;  %v1718_v25 = vpop.f32.mrf.mxu2  ;;  %v1747_v13 = vpop.f32.mrf.mxu3 }
 0x3c6   : > { %v4285_v27 = vadd.f32 %v1718_v25, %v1604_v46  ;;  %v4287_v28 = vadd.f32 %v1747_v13, %v1633_v7 }
 0x3cb   : > { %v1606_v22 = vpop.f32.mrf.mxu0  ;;  %v1635_v26 = vpop.f32.mrf.mxu1 }
 0x3cc   : > { %v1607_v53 = vadd.f32 %v1606_v22, %v1484_v33  ;;  %v1636_v56 = vadd.f32 %v1635_v26, %v1513_v62  ;;  %v1721_v3 = vpop.f32.mrf.mxu2  ;;  %v1750_v55 = vpop.f32.mrf.mxu3 }
 0x3ce   : > { %v4289_v29 = vadd.f32 %v1721_v3, %v1607_v53  ;;  %v4291_v51 = vadd.f32 %v1750_v55, %v1636_v56 }
 0x3d3   : > { %v1609_v8 = vpop.f32.mrf.mxu0  ;;  %v1638_v23 = vpop.f32.mrf.mxu1 }
 0x3d4   : > { %v1610_v43 = vadd.f32 %v1609_v8, %v1487_v18  ;;  %v1639_v49 = vadd.f32 %v1638_v23, %v1516_v48  ;;  %v1724_v60 = vpop.f32.mrf.mxu2  ;;  %v1753_v14 = vpop.f32.mrf.mxu3 }
 0x3d6   : > { %v4293_v39 = vadd.f32 %v1724_v60, %v1610_v43  ;;  %v4295_v58 = vadd.f32 %v1753_v14, %v1639_v49 }
 0x3db   : > { %v1850_v37 = vpop.f32.mrf.mxu0  ;;  %v1879_v35 = vpop.f32.mrf.mxu1 }
 0x3dc   : > { %v1920_v47 = vpop.f32.mrf.mxu2  ;;  %v1949_v1 = vpop.f32.mrf.mxu3 }
 0x3dd   : > { %v1921_v21 = vadd.f32 %v1920_v47, %v1850_v37  ;;  %v1950_v40 = vadd.f32 %v1949_v1, %v1879_v35 }
 0x3e3   : > { %v1853_v24 = vpop.f32.mrf.mxu0  ;;  %v1882_v15 = vpop.f32.mrf.mxu1 }
 0x3e4   : > { %v1923_v44 = vpop.f32.mrf.mxu2  ;;  %v1952_v50 = vpop.f32.mrf.mxu3 }
 0x3e5   : > { %v1924_v3 = vadd.f32 %v1923_v44, %v1853_v24  ;;  %v1953_v55 = vadd.f32 %v1952_v50, %v1882_v15 }
 0x3eb   : > { %v1856_v41 = vpop.f32.mrf.mxu0  ;;  %v1885_v57 = vpop.f32.mrf.mxu1 }
 0x3ec   : > { %v1926_v2 = vpop.f32.mrf.mxu2  ;;  %v1955_v31 = vpop.f32.mrf.mxu3 }
 0x3f3   : > { %v4297_v38 = vpop.f32.mrf.mxu0  ;;  %v4299_v52 = vpop.f32.mrf.mxu1 }
 0x3f4   : > { %v4301_v5 = vpop.f32.mrf.mxu2  ;;  %v4303_v19 = vpop.f32.mrf.mxu3 }
 0x3fb   : > { %v2035_v59 = vpop.f32.mrf.mxu0  ;;  %v2064_v0 = vpop.f32.mrf.mxu1 }
 0x3fc   : > { %v2179_v9 = vpop.f32.mrf.mxu2  ;;  %v2208_v34 = vpop.f32.mrf.mxu3  ;;  %v2076_v42 = vadd.f32 %v2035_v59, %v1921_v21  ;;  %v2077_v10 = vadd.f32 %v2064_v0, %v1950_v40  ;;  %v3203_v59 = vld [vmem:[%s3279_s21 + $0x8] sm:$0xff]  ;;  %v1927_v21 = vadd.f32 %v1926_v2, %v1856_v41  ;;  %v1956_v40 = vadd.f32 %v1955_v31, %v1885_v57 }
 0x3fe   : > { %v2084_v25 = vmul.f32 %v3822_v54, %v2076_v42  ;;  %v2085_v13 = vmul.f32 %v3858_v17, %v2077_v10 }
 0x400   : > { %v2092_v60 = vadd.f32 %v2084_v25, %v4281_v45  ;;  %v2093_v14 = vadd.f32 %v2085_v13, %v4283_v36  ;;  %v3202_v36 = vld [vmem:[%s3279_s21] sm:$0xff] }
 0x403   : > { %v2038_v61 = vpop.f32.mrf.mxu0  ;;  %v2067_v33 = vpop.f32.mrf.mxu1 }
 0x404   : > { %v2182_v62 = vpop.f32.mrf.mxu2  ;;  %v2211_v11 = vpop.f32.mrf.mxu3  ;;  %v2078_v43 = vadd.f32 %v2038_v61, %v1924_v3  ;;  %v2079_v49 = vadd.f32 %v2067_v33, %v1953_v55 }
 0x406   : > { %v2086_v24 = vmul.f32 %v3822_v54, %v2078_v43  ;;  %v2087_v15 = vmul.f32 %v3858_v17, %v2079_v49 }
 0x408   : > { %v2094_v25 = vadd.f32 %v2086_v24, %v4285_v27  ;;  %v2095_v13 = vadd.f32 %v2087_v15, %v4287_v28  ;;  %v3207_v24 = vld [vmem:[%s3279_s21 + $0x28] sm:$0xff] }
 0x40b   : > { %v2041_v16 = vpop.f32.mrf.mxu0  ;;  %v2070_v18 = vpop.f32.mrf.mxu1 }
 0x40c   : > { %v4305_v48 = vpop.f32.mrf.mxu2  ;;  %v4307_v6 = vpop.f32.mrf.mxu3 }
 0x413   : > { %v4309_v63 = vpop.f32.mrf.mxu0  ;;  %v4311_v12 = vpop.f32.mrf.mxu1 }
 0x414   : > { %v4313_v20 = vpop.f32.mrf.mxu2  ;;  %v4315_v4 = vpop.f32.mrf.mxu3 }
 0x41b   : > { %v2289_v46 = vpop.f32.mrf.mxu0  ;;  %v2318_v7 = vpop.f32.mrf.mxu1 }
 0x41c   : > { %v2290_v22 = vadd.f32 %v2289_v46, %v2179_v9  ;;  %v2319_v26 = vadd.f32 %v2318_v7, %v2208_v34  ;;  %v2404_v53 = vpop.f32.mrf.mxu2  ;;  %v2433_v56 = vpop.f32.mrf.mxu3  ;;  %v2080_v46 = vadd.f32 %v2041_v16, %v1927_v21  ;;  %v2081_v7 = vadd.f32 %v2070_v18, %v1956_v40  ;;  %v3204_v16 = vld [vmem:[%s3279_s21 + $0x10] sm:$0xff] }
 0x41e   : > { %v2445_v8 = vadd.f32 %v2404_v53, %v2290_v22  ;;  %v2446_v23 = vadd.f32 %v2433_v56, %v2319_v26  ;;  %v2088_v57 = vmul.f32 %v3822_v54, %v2080_v46  ;;  %v2089_v2 = vmul.f32 %v3858_v17, %v2081_v7  ;;  %v3205_v53 = vld [vmem:[%s3279_s21 + $0x18] sm:$0xff] }
 0x420   : > { %v2453_v37 = vmul.f32 %v3844_v32, %v2445_v8  ;;  %v2454_v35 = vmul.f32 %v3883_v30, %v2446_v23  ;;  %v1930_v8 = vadd.f32 %v4301_v5, %v4297_v38  ;;  %v1959_v23 = vadd.f32 %v4303_v19, %v4299_v52 }
 0x422   : > { %v2461_v47 = vadd.f32 %v2453_v37, %v2092_v60  ;;  %v2462_v1 = vadd.f32 %v2454_v35, %v2093_v14  ;;  %v2082_v60 = vadd.f32 %v4309_v63, %v1930_v8  ;;  %v2083_v14 = vadd.f32 %v4311_v12, %v1959_v23  ;;  %v3206_v12 = vld [vmem:[%s3279_s21 + $0x20] sm:$0xff] }
 0x423   : > { %v2292_v45 = vpop.f32.mrf.mxu0  ;;  %v2321_v44 = vpop.f32.mrf.mxu1 }
 0x424   : > { %v2469_v50 = vadd.f32 %v3202_v36, %v2461_v47  ;;  %v2470_v0 = vadd.f32 %v3203_v59, %v2462_v1  ;;  %v2293_v9 = vadd.f32 %v2292_v45, %v2182_v62  ;;  %v2322_v34 = vadd.f32 %v2321_v44, %v2211_v11  ;;  %v2407_v61 = vpop.f32.mrf.mxu2  ;;  %v2436_v33 = vpop.f32.mrf.mxu3 }
 0x425   : > { %v2090_v19 = vmul.f32 %v3822_v54, %v2082_v60  ;;  %v2091_v35 = vmul.f32 %v3858_v17, %v2083_v14 }
 0x426   : > { %2477 = vst [vmem:[%s4328_s27] sm:$0xff] %v2469_v50  ;;  %v2447_v42 = vadd.f32 %v2407_v61, %v2293_v9  ;;  %v2448_v10 = vadd.f32 %v2436_v33, %v2322_v34  ;;  %v3208_v34 = vld [vmem:[%s3279_s21 + $0x30] sm:$0xff]  ;;  %v3209_v61 = vld [vmem:[%s3279_s21 + $0x38] sm:$0xff] }
 0x427   : > { %2478 = vst [vmem:[%s4328_s27 + $0x8] sm:$0xff] %v2470_v0  ;;  %v2098_v17 = vadd.f32 %v2090_v19, %v4293_v39  ;;  %v2099_v50 = vadd.f32 %v2091_v35, %v4295_v58 }
 0x428   : > { %v2455_v22 = vmul.f32 %v3844_v32, %v2447_v42  ;;  %v2456_v62 = vmul.f32 %v3883_v30, %v2448_v10 }
 0x42a   : > { %v2463_v11 = vadd.f32 %v2455_v22, %v2094_v25  ;;  %v2464_v41 = vadd.f32 %v2456_v62, %v2095_v13 }
 0x42b   : > { %v2295_v31 = vpop.f32.mrf.mxu0  ;;  %v2324_v26 = vpop.f32.mrf.mxu1 }
 0x42c   : > { %v2471_v18 = vadd.f32 %v3204_v16, %v2463_v11  ;;  %v2472_v27 = vadd.f32 %v3205_v53, %v2464_v41  ;;  %v2296_v28 = vadd.f32 %v2295_v31, %v4305_v48  ;;  %v2325_v56 = vadd.f32 %v2324_v26, %v4307_v6  ;;  %v2410_v3 = vpop.f32.mrf.mxu2  ;;  %v2439_v55 = vpop.f32.mrf.mxu3 }
 0x42d   : > { %v2096_v48 = vadd.f32 %v2088_v57, %v4289_v29  ;;  %v2097_v6 = vadd.f32 %v2089_v2, %v4291_v51 }
 0x42e   : > { %2479 = vst [vmem:[%s4328_s27 + $0x10] sm:$0xff] %v2471_v18  ;;  %v2449_v43 = vadd.f32 %v2410_v3, %v2296_v28  ;;  %v2450_v49 = vadd.f32 %v2439_v55, %v2325_v56 }
 0x42f   : > { %2480 = vst [vmem:[%s4328_s27 + $0x18] sm:$0xff] %v2472_v27 }
 0x430   : > { %v2457_v37 = vmul.f32 %v3844_v32, %v2449_v43  ;;  %v2458_v38 = vmul.f32 %v3883_v30, %v2450_v49 }
 0x432   : > { %v2465_v52 = vadd.f32 %v2457_v37, %v2096_v48  ;;  %v2466_v5 = vadd.f32 %v2458_v38, %v2097_v6 }
 0x433   : > { %v2298_v63 = vpop.f32.mrf.mxu0  ;;  %v2327_v47 = vpop.f32.mrf.mxu1 }
 0x434   : > { %v2473_v1 = vadd.f32 %v3206_v12, %v2465_v52  ;;  %v2474_v29 = vadd.f32 %v3207_v24, %v2466_v5  ;;  %v2299_v51 = vadd.f32 %v2298_v63, %v4313_v20  ;;  %v2328_v15 = vadd.f32 %v2327_v47, %v4315_v4  ;;  %v2413_v45 = vpop.f32.mrf.mxu2  ;;  %v2442_v44 = vpop.f32.mrf.mxu3 }
 0x436   : > { %2481 = vst [vmem:[%s4328_s27 + $0x20] sm:$0xff] %v2473_v1  ;;  %v2451_v54 = vadd.f32 %v2413_v45, %v2299_v51  ;;  %v2452_v36 = vadd.f32 %v2442_v44, %v2328_v15 }
 0x437   : > { %2482 = vst [vmem:[%s4328_s27 + $0x28] sm:$0xff] %v2474_v29 }
 0x438   : > { %v2459_v59 = vmul.f32 %v3844_v32, %v2451_v54  ;;  %v2460_v0 = vmul.f32 %v3883_v30, %v2452_v36 }
 0x43a   : > { %v2467_v20 = vadd.f32 %v2459_v59, %v2098_v17  ;;  %v2468_v9 = vadd.f32 %v2460_v0, %v2099_v50 }
 0x43c   : > { %v2475_v4 = vadd.f32 %v3208_v34, %v2467_v20  ;;  %v2476_v33 = vadd.f32 %v3209_v61, %v2468_v9 }
 0x43e   : > { %2483 = vst [vmem:[%s4328_s27 + $0x30] sm:$0xff] %v2475_v4 }
 0x43f   : > { %2484 = vst [vmem:[%s4328_s27 + $0x38] sm:$0xff] %v2476_v33 }
 0x440 PF: > { %s15_s17 = sadd.s32 1, %s3216_s17  }
 0x441   : > { %p12_p4 = scmp.ge.s32.totalorder %s15_s17, 4  }
 0x443   :  { %14 = sbr.rel (!%p12_p4) target bundleno = 2 (0x2), region = 82 }

</bundles_post_ra>
